<compile_context>
chip_gen: v5e
topology: v5e:2x2
jax: 0.10.0
libtpu: 0.0.40
codegen_flags: <defaults>
</compile_context>

<pallas_src>
from functools import partial

import jax
import jax.numpy as jnp
from jax.experimental import pallas as pl
from jax.experimental.pallas import tpu as pltpu

LANE = 128


def _round_up(x, m):
    return (x + m - 1) // m * m


# ------------------------------ fused kernel ------------------------------- #

def _bottleneck_kernel(x_body_ref, x_top_ref, x_bot_ref,
                       w1_ref, b1_ref, w2_ref, b2_ref, w3_ref, b3_ref,
                       o_ref):
    """One (batch, row-tile) grid step of the fused Bottleneck block.

    x_body_ref : (1, TH, W, Cp) bf16  rows of this tile
    x_top_ref  : (1, 1,  W, Cp) bf16  row above the tile (border-clamped)
    x_bot_ref  : (1, 1,  W, Cp) bf16  row below the tile (border-clamped)
    w1_ref     : (Cp, Wp)       bf16  conv1 weight * bn1 scale
    b1_ref     : (1, Wp)        f32   bn1 bias
    w2_ref     : (9*Wp, Wp)     bf16  conv2 im2col weight * bn2 scale
    b2_ref     : (1, Wp)        f32
    w3_ref     : (Wp, Cp)       bf16  conv3 weight * bn3 scale
    b3_ref     : (1, Cp)        f32
    o_ref      : (1, TH, W, Cp) f32
    """
    t = pl.program_id(1)
    # gates: halo rows that fall outside the image are conv2 SAME padding and
    # must be exact zeros (the clamped fetch + folded bn1 bias would leak in).
    top_gate = (t > 0).astype(jnp.float32)
    bot_gate = (t < pl.num_programs(1) - 1).astype(jnp.float32)

    _, th, w, cp = x_body_ref.shape
    wp = w1_ref.shape[1]
    m = th * w

    w1 = w1_ref[...]
    b1 = b1_ref[...]

    def conv1_bn_relu(x2d):  # 1x1 conv + bn1 + relu, f32 accumulate/result
        y = jnp.dot(x2d, w1, preferred_element_type=jnp.float32)
        return jnp.maximum(y + b1, 0.0)

    # conv1 on the tile body and on the two halo rows (tiny matmuls).
    x_body = x_body_ref[...].reshape(m, cp)
    h1_body = conv1_bn_relu(x_body).astype(jnp.bfloat16).reshape(th, w, wp)
    h1_top = (top_gate * conv1_bn_relu(x_top_ref[...].reshape(w, cp)))
    h1_top = h1_top.astype(jnp.bfloat16).reshape(1, w, wp)
    h1_bot = (bot_gate * conv1_bn_relu(x_bot_ref[...].reshape(w, cp)))
    h1_bot = h1_bot.astype(jnp.bfloat16).reshape(1, w, wp)

    # Haloed, zero-padded conv2 input slab (TH+2, W+2, Wp) -- stays in VMEM.
    slab = jnp.concatenate([h1_top, h1_body, h1_bot], axis=0)
    zcol = jnp.zeros((th + 2, 1, wp), jnp.bfloat16)
    slab = jnp.concatenate([zcol, slab, zcol], axis=1)

    # conv2 (3x3, stride 1, SAME) as ONE MXU matmul with K = 9*Wp.
    # K index ordering = (dy*3 + dx)*Wp + cin, matching the folded w2 layout.
    cols = jnp.concatenate([slab[:, dx:dx + w, :] for dx in range(3)], axis=-1)
    patches = jnp.concatenate([cols[dy:dy + th] for dy in range(3)], axis=-1)
    p = patches.reshape(m, 9 * wp)
    h2 = jnp.dot(p, w2_ref[...], preferred_element_type=jnp.float32)
    h2 = jnp.maximum(h2 + b2_ref[...], 0.0).astype(jnp.bfloat16)

    # conv3 (1x1) + bn3 + residual + relu, fused f32 epilogue.
    out = jnp.dot(h2, w3_ref[...], preferred_element_type=jnp.float32)
    out = out + b3_ref[...] + x_body.astype(jnp.float32)
    out = jnp.maximum(out, 0.0)
    o_ref[...] = out.reshape(1, th, w, cp).astype(o_ref.dtype)


# ------------------------------- wrapper ----------------------------------- #

def _pick_tile_h(h, w):
    """Largest divisor of H whose tile keeps the in-kernel im2col slab small."""
    for th in range(min(h, 256), 0, -1):
        if h % th == 0 and th * w <= 2048:
            return th
    return 1


@partial(jax.jit, static_argnames=("tile_h",))
def bottleneck_forward(x_nchw, params, tile_h=None):
    n, cin, h, w = x_nchw.shape
    cp = params["w1"].shape[0]          # lane-padded in/out channels
    wp = params["w1"].shape[1]          # lane-padded bottleneck width
    assert params["w3"].shape[1] == cp, "identity path needs inplanes == planes*4"

    if tile_h is None:
        tile_h = _pick_tile_h(h, w)
    assert h % tile_h == 0, "tile_h must divide H"
    num_t = h // tile_h

    # NCHW -> NHWC, zero-pad channels to the lane-aligned width, cast to bf16.
    # TODO(synk): if the surrounding graph can stay NHWC/bf16, drop this
    # transpose+pad (and the inverse at the end) to save two HBM passes.
    x_nhwc = jnp.transpose(x_nchw, (0, 2, 3, 1))
    x_p = jnp.pad(x_nhwc, ((0, 0), (0, 0), (0, 0), (0, cp - cin)))
    x_p = x_p.astype(jnp.bfloat16)

    body_spec = pl.BlockSpec((1, tile_h, w, cp), lambda ni, ti: (ni, ti, 0, 0))
    # conv2 halo rows: one row above / below the tile, clamped at the image
    # border (the kernel zero-gates the out-of-image case).
    top_spec = pl.BlockSpec(
        (1, 1, w, cp),
        lambda ni, ti: (ni, jnp.maximum(ti * tile_h - 1, 0), 0, 0))
    bot_spec = pl.BlockSpec(
        (1, 1, w, cp),
        lambda ni, ti: (ni, jnp.minimum((ti + 1) * tile_h, h - 1), 0, 0))

    def resident(shape):  # weights/biases: one block, stays in VMEM
        return pl.BlockSpec(shape, lambda ni, ti: (0,) * len(shape))

    out_p = pl.pallas_call(
        _bottleneck_kernel,
        out_shape=jax.ShapeDtypeStruct((n, h, w, cp), jnp.float32),
        grid_spec=pltpu.PrefetchScalarGridSpec(
            num_scalar_prefetch=0,
            grid=(n, num_t),
            in_specs=[
                body_spec, top_spec, bot_spec,
                resident(params["w1"].shape), resident(params["b1"].shape),
                resident(params["w2"].shape), resident(params["b2"].shape),
                resident(params["w3"].shape), resident(params["b3"].shape),
            ],
            out_specs=body_spec,
        ),
        compiler_params=pltpu.CompilerParams(
            dimension_semantics=("parallel", "parallel"),
            vmem_limit_bytes=32 * 1024 * 1024,
        ),
    )(x_p, x_p, x_p,
      params["w1"], params["b1"], params["w2"], params["b2"],
      params["w3"], params["b3"])

    out = out_p[..., :cin]
    return jnp.transpose(out, (0, 3, 1, 2))


# --------------------------- parameter generation -------------------------- #

def init_params(key, inplanes, planes, base_width=64, groups=1):
    """Random PyTorch-layout parameters for the Bottleneck block."""
    width = int(planes * (base_width / 64.0)) * groups
    cout = planes * 4
    assert inplanes == cout, "downsample=None requires inplanes == planes * 4"
    ks = jax.random.split(key, 15)

    def bn(kg, kb, km, kv, c):
        return dict(
            gamma=jax.random.uniform(kg, (c,), jnp.float32, 0.5, 1.5),
            beta=0.1 * jax.random.normal(kb, (c,), jnp.float32),
            mean=0.1 * jax.random.normal(km, (c,), jnp.float32),
            var=jax.random.uniform(kv, (c,), jnp.float32, 0.5, 1.5),
        )

    return dict(
        conv1_w=0.1 * jax.random.normal(ks[0], (width, inplanes, 1, 1), jnp.float32),
        conv2_w=0.1 * jax.random.normal(ks[1], (width, width, 3, 3), jnp.float32),
        conv3_w=0.1 * jax.random.normal(ks[2], (cout, width, 1, 1), jnp.float32),
        bn1=bn(ks[3], ks[4], ks[5], ks[6], width),
        bn2=bn(ks[7], ks[8], ks[9], ks[10], width),
        bn3=bn(ks[11], ks[12], ks[13], ks[14], cout),
    )


def fold_params(raw, eps=1e-5):
    """Fold BN scale into the conv weights, pad channels to lane multiples,
    cast matmul weights to bf16 (biases stay f32)."""
    def bn_fold(bn):
        scale = bn["gamma"] / jnp.sqrt(bn["var"] + eps)
        bias = bn["beta"] - bn["mean"] * scale
        return scale, bias

    s1, b1 = bn_fold(raw["bn1"])
    s2, b2 = bn_fold(raw["bn2"])
    s3, b3 = bn_fold(raw["bn3"])

    width, cin = raw["conv1_w"].shape[:2]
    cout = raw["conv3_w"].shape[0]
    assert cin == cout
    cp = _round_up(max(cin, cout), LANE)
    wp = _round_up(width, LANE)

    w1 = raw["conv1_w"][:, :, 0, 0].T * s1[None, :]                  # (in, out)
    w2 = jnp.transpose(raw["conv2_w"], (2, 3, 1, 0)) * s2[None, None, None, :]
    w3 = raw["conv3_w"][:, :, 0, 0].T * s3[None, :]                  # (in, out)

    w1p = jnp.pad(w1, ((0, cp - cin), (0, wp - width)))
    w2p = jnp.pad(w2, ((0, 0), (0, 0), (0, wp - width), (0, wp - width)))
    w2p = w2p.reshape(9 * wp, wp)                                    # (ky*3+kx)*wp + cin
    w3p = jnp.pad(w3, ((0, wp - width), (0, cp - cout)))

    def padb(b, c, cpad):
        return jnp.pad(b, (0, cpad - c)).reshape(1, cpad).astype(jnp.float32)

    return dict(
        w1=w1p.astype(jnp.bfloat16), b1=padb(b1, width, wp),
        w2=w2p.astype(jnp.bfloat16), b2=padb(b2, width, wp),
        w3=w3p.astype(jnp.bfloat16), b3=padb(b3, cout, cp),
    )


# ------------------------------ pure-JAX ref -------------------------------- #

def bottleneck_ref(x_nchw, params):
    """f32 reference on the same folded/padded (bf16-rounded) parameters."""
    n, cin, h, w = x_nchw.shape
    cp = params["w1"].shape[0]
    wp = params["w1"].shape[1]
    hi = jax.lax.Precision.HIGHEST

    x = jnp.transpose(x_nchw, (0, 2, 3, 1))
    x = jnp.pad(x, ((0, 0), (0, 0), (0, 0), (0, cp - cin)))
    x = x.astype(jnp.bfloat16).astype(jnp.float32)   # same input rounding as kernel

    w1 = params["w1"].astype(jnp.float32)
    w2 = params["w2"].astype(jnp.float32).reshape(3, 3, wp, wp)
    w3 = params["w3"].astype(jnp.float32)

    h1 = jnp.maximum(jnp.einsum("nhwc,cf->nhwf", x, w1, precision=hi)
                     + params["b1"][0], 0.0)
    h2 = jax.lax.conv_general_dilated(
        h1, w2, (1, 1), "SAME",
        dimension_numbers=("NHWC", "HWIO", "NHWC"), precision=hi)
    h2 = jnp.maximum(h2 + params["b2"][0], 0.0)
    out = jnp.einsum("nhwf,fc->nhwc", h2, w3, precision=hi) + params["b3"][0] + x
    out = jnp.maximum(out, 0.0)
    return jnp.transpose(out[..., :cin], (0, 3, 1, 2))


# ---------------------------------- main ------------------------------------ #

if __name__ == "__main__":
    key = jax.random.PRNGKey(0)
    kx, kp = jax.random.split(key)

    # Small shapes consistent with the module: inplanes == planes*4 so the
    # identity branch (downsample=None) is valid.
    N, inplanes, H, W = 2, 16, 16, 16
    planes = 4                                   # width = 4, cout = 16

    x = jax.random.normal(kx, (N, inplanes, H, W), jnp.float32)   # NCHW input
    params = fold_params(init_params(kp, inplanes, planes))

    # tile_h=8 -> two row tiles per image, so the halo / gating paths run.
    out = bottleneck_forward(x, params, tile_h=8)
    out = jax.block_until_ready(out)
    assert out.shape == (N, planes * 4, H, W)

    ref = bottleneck_ref(x, params)
    max_err = float(jnp.max(jnp.abs(out - ref)))
    assert max_err < 2e-2, f"mismatch vs reference, max abs err = {max_err}"

    print("KERNEL_OK")
</pallas_src>

<mosaic_0001>
module attributes {stable_mosaic.version = 11 : i64} {
  func.func @_bottleneck_kernel(%arg0: i32, %arg1: i32, %arg2: memref<1x8x16x128xbf16, #tpu.memory_space<vmem>>, %arg3: memref<1x1x16x128xbf16, #tpu.memory_space<vmem>>, %arg4: memref<1x1x16x128xbf16, #tpu.memory_space<vmem>>, %arg5: memref<128x128xbf16, #tpu.memory_space<vmem>>, %arg6: memref<1x128xf32, #tpu.memory_space<vmem>>, %arg7: memref<1152x128xbf16, #tpu.memory_space<vmem>>, %arg8: memref<1x128xf32, #tpu.memory_space<vmem>>, %arg9: memref<128x128xbf16, #tpu.memory_space<vmem>>, %arg10: memref<1x128xf32, #tpu.memory_space<vmem>>, %arg11: memref<1x8x16x128xf32, #tpu.memory_space<vmem>>) attributes {dimension_semantics = [#tpu.dimension_semantics<parallel>, #tpu.dimension_semantics<parallel>], iteration_bounds = array<i64: 2, 2>, scalar_prefetch = 0 : i64, scratch_operands = 0 : i64, tpu.core_type = #tpu.core_type<tc>, window_params = [{transform_indices = @transform_0, window_bounds = array<i64: 1, 8, 16, 128>}, {transform_indices = @transform_1, window_bounds = array<i64: 1, 1, 16, 128>}, {transform_indices = @transform_2, window_bounds = array<i64: 1, 1, 16, 128>}, {pipeline_mode = #tpu.pipeline_mode<synchronous>, transform_indices = @transform_3, window_bounds = array<i64: 128, 128>}, {pipeline_mode = #tpu.pipeline_mode<synchronous>, transform_indices = @transform_4, window_bounds = array<i64: 1, 128>}, {pipeline_mode = #tpu.pipeline_mode<synchronous>, transform_indices = @transform_5, window_bounds = array<i64: 1152, 128>}, {pipeline_mode = #tpu.pipeline_mode<synchronous>, transform_indices = @transform_6, window_bounds = array<i64: 1, 128>}, {pipeline_mode = #tpu.pipeline_mode<synchronous>, transform_indices = @transform_7, window_bounds = array<i64: 128, 128>}, {pipeline_mode = #tpu.pipeline_mode<synchronous>, transform_indices = @transform_8, window_bounds = array<i64: 1, 128>}, {transform_indices = @transform_9, window_bounds = array<i64: 1, 8, 16, 128>}]} {
    %c0_i32 = arith.constant 0 : i32
    %0 = arith.cmpi sgt, %arg1, %c0_i32 : i32
    %1 = arith.extui %0 : i1 to i32
    %2 = arith.sitofp %1 : i32 to f32
    %c1_i32 = arith.constant 1 : i32
    %3 = arith.cmpi slt, %arg1, %c1_i32 : i32
    %4 = arith.extui %3 : i1 to i32
    %5 = arith.sitofp %4 : i32 to f32
    %c0 = arith.constant 0 : index
    %c0_0 = arith.constant 0 : index
    %6 = vector.load %arg5[%c0, %c0_0] : memref<128x128xbf16, #tpu.memory_space<vmem>>, vector<128x128xbf16>
    %c0_1 = arith.constant 0 : index
    %c0_2 = arith.constant 0 : index
    %7 = vector.load %arg6[%c0_1, %c0_2] : memref<1x128xf32, #tpu.memory_space<vmem>>, vector<1x128xf32>
    %c0_3 = arith.constant 0 : index
    %c0_4 = arith.constant 0 : index
    %c0_5 = arith.constant 0 : index
    %c0_6 = arith.constant 0 : index
    %8 = vector.load %arg2[%c0_3, %c0_4, %c0_5, %c0_6] : memref<1x8x16x128xbf16, #tpu.memory_space<vmem>>, vector<1x8x16x128xbf16>
    %9 = vector.shape_cast %8 : vector<1x8x16x128xbf16> to vector<128x128xbf16>
    %cst = arith.constant dense<0.000000e+00> : vector<128x128xf32>
    %10 = tpu.matmul %9, %6, %cst {dimension_numbers = #tpu.dot_dimension_numbers<[1], [0], [0], [1], [0, 0, 1, 1], [], []>} : vector<128x128xbf16>, vector<128x128xbf16>, vector<128x128xf32> -> vector<128x128xf32>
    %11 = vector.broadcast %7 : vector<1x128xf32> to vector<128x128xf32>
    %12 = arith.addf %10, %11 : vector<128x128xf32>
    %cst_7 = arith.constant 0.000000e+00 : f32
    %13 = vector.broadcast %cst_7 : f32 to vector<128x128xf32>
    %14 = arith.maximumf %12, %13 : vector<128x128xf32>
    %15 = arith.truncf %14 : vector<128x128xf32> to vector<128x128xbf16>
    %16 = vector.shape_cast %15 : vector<128x128xbf16> to vector<8x16x128xbf16>
    %c0_8 = arith.constant 0 : index
    %c0_9 = arith.constant 0 : index
    %c0_10 = arith.constant 0 : index
    %c0_11 = arith.constant 0 : index
    %17 = vector.load %arg3[%c0_8, %c0_9, %c0_10, %c0_11] : memref<1x1x16x128xbf16, #tpu.memory_space<vmem>>, vector<1x1x16x128xbf16>
    %18 = vector.shape_cast %17 : vector<1x1x16x128xbf16> to vector<16x128xbf16>
    %cst_12 = arith.constant dense<0.000000e+00> : vector<16x128xf32>
    %19 = tpu.matmul %18, %6, %cst_12 {dimension_numbers = #tpu.dot_dimension_numbers<[1], [0], [0], [1], [0, 0, 1, 1], [], []>} : vector<16x128xbf16>, vector<128x128xbf16>, vector<16x128xf32> -> vector<16x128xf32>
    %20 = vector.broadcast %7 : vector<1x128xf32> to vector<16x128xf32>
    %21 = arith.addf %19, %20 : vector<16x128xf32>
    %cst_13 = arith.constant 0.000000e+00 : f32
    %22 = vector.broadcast %cst_13 : f32 to vector<16x128xf32>
    %23 = arith.maximumf %21, %22 : vector<16x128xf32>
    %24 = vector.broadcast %2 : f32 to vector<16x128xf32>
    %25 = arith.mulf %24, %23 : vector<16x128xf32>
    %26 = arith.truncf %25 : vector<16x128xf32> to vector<16x128xbf16>
    %27 = vector.shape_cast %26 : vector<16x128xbf16> to vector<1x16x128xbf16>
    %c0_14 = arith.constant 0 : index
    %c0_15 = arith.constant 0 : index
    %c0_16 = arith.constant 0 : index
    %c0_17 = arith.constant 0 : index
    %28 = vector.load %arg4[%c0_14, %c0_15, %c0_16, %c0_17] : memref<1x1x16x128xbf16, #tpu.memory_space<vmem>>, vector<1x1x16x128xbf16>
    %29 = vector.shape_cast %28 : vector<1x1x16x128xbf16> to vector<16x128xbf16>
    %cst_18 = arith.constant dense<0.000000e+00> : vector<16x128xf32>
    %30 = tpu.matmul %29, %6, %cst_18 {dimension_numbers = #tpu.dot_dimension_numbers<[1], [0], [0], [1], [0, 0, 1, 1], [], []>} : vector<16x128xbf16>, vector<128x128xbf16>, vector<16x128xf32> -> vector<16x128xf32>
    %31 = vector.broadcast %7 : vector<1x128xf32> to vector<16x128xf32>
    %32 = arith.addf %30, %31 : vector<16x128xf32>
    %cst_19 = arith.constant 0.000000e+00 : f32
    %33 = vector.broadcast %cst_19 : f32 to vector<16x128xf32>
    %34 = arith.maximumf %32, %33 : vector<16x128xf32>
    %35 = vector.broadcast %5 : f32 to vector<16x128xf32>
    %36 = arith.mulf %35, %34 : vector<16x128xf32>
    %37 = arith.truncf %36 : vector<16x128xf32> to vector<16x128xbf16>
    %38 = vector.shape_cast %37 : vector<16x128xbf16> to vector<1x16x128xbf16>
    %39 = tpu.concatenate %27, %16, %38 in 0 : vector<1x16x128xbf16>, vector<8x16x128xbf16>, vector<1x16x128xbf16> -> vector<10x16x128xbf16>
    %cst_20 = arith.constant 0.000000e+00 : bf16
    %40 = vector.broadcast %cst_20 : bf16 to vector<10x1x128xbf16>
    %41 = tpu.concatenate %40, %39, %40 in 1 : vector<10x1x128xbf16>, vector<10x16x128xbf16>, vector<10x1x128xbf16> -> vector<10x18x128xbf16>
    %42 = vector.extract_strided_slice %41 {offsets = [0, 0, 0], sizes = [10, 16, 128], strides = [1, 1, 1]} : vector<10x18x128xbf16> to vector<10x16x128xbf16>
    %43 = vector.extract_strided_slice %41 {offsets = [0, 1, 0], sizes = [10, 16, 128], strides = [1, 1, 1]} : vector<10x18x128xbf16> to vector<10x16x128xbf16>
    %44 = vector.extract_strided_slice %41 {offsets = [0, 2, 0], sizes = [10, 16, 128], strides = [1, 1, 1]} : vector<10x18x128xbf16> to vector<10x16x128xbf16>
    %45 = tpu.concatenate %42, %43, %44 in 2 : vector<10x16x128xbf16>, vector<10x16x128xbf16>, vector<10x16x128xbf16> -> vector<10x16x384xbf16>
    %46 = vector.extract_strided_slice %45 {offsets = [0, 0, 0], sizes = [8, 16, 384], strides = [1, 1, 1]} : vector<10x16x384xbf16> to vector<8x16x384xbf16>
    %47 = vector.extract_strided_slice %45 {offsets = [1, 0, 0], sizes = [8, 16, 384], strides = [1, 1, 1]} : vector<10x16x384xbf16> to vector<8x16x384xbf16>
    %48 = vector.extract_strided_slice %45 {offsets = [2, 0, 0], sizes = [8, 16, 384], strides = [1, 1, 1]} : vector<10x16x384xbf16> to vector<8x16x384xbf16>
    %49 = tpu.concatenate %46, %47, %48 in 2 : vector<8x16x384xbf16>, vector<8x16x384xbf16>, vector<8x16x384xbf16> -> vector<8x16x1152xbf16>
    %50 = vector.shape_cast %49 : vector<8x16x1152xbf16> to vector<128x1152xbf16>
    %c0_21 = arith.constant 0 : index
    %c0_22 = arith.constant 0 : index
    %51 = vector.load %arg7[%c0_21, %c0_22] : memref<1152x128xbf16, #tpu.memory_space<vmem>>, vector<1152x128xbf16>
    %cst_23 = arith.constant dense<0.000000e+00> : vector<128x128xf32>
    %52 = tpu.matmul %50, %51, %cst_23 {dimension_numbers = #tpu.dot_dimension_numbers<[1], [0], [0], [1], [0, 0, 1, 1], [], []>} : vector<128x1152xbf16>, vector<1152x128xbf16>, vector<128x128xf32> -> vector<128x128xf32>
    %c0_24 = arith.constant 0 : index
    %c0_25 = arith.constant 0 : index
    %53 = vector.load %arg8[%c0_24, %c0_25] : memref<1x128xf32, #tpu.memory_space<vmem>>, vector<1x128xf32>
    %54 = vector.broadcast %53 : vector<1x128xf32> to vector<128x128xf32>
    %55 = arith.addf %52, %54 : vector<128x128xf32>
    %cst_26 = arith.constant 0.000000e+00 : f32
    %56 = vector.broadcast %cst_26 : f32 to vector<128x128xf32>
    %57 = arith.maximumf %55, %56 : vector<128x128xf32>
    %58 = arith.truncf %57 : vector<128x128xf32> to vector<128x128xbf16>
    %c0_27 = arith.constant 0 : index
    %c0_28 = arith.constant 0 : index
    %59 = vector.load %arg9[%c0_27, %c0_28] : memref<128x128xbf16, #tpu.memory_space<vmem>>, vector<128x128xbf16>
    %cst_29 = arith.constant dense<0.000000e+00> : vector<128x128xf32>
    %60 = tpu.matmul %58, %59, %cst_29 {dimension_numbers = #tpu.dot_dimension_numbers<[1], [0], [0], [1], [0, 0, 1, 1], [], []>} : vector<128x128xbf16>, vector<128x128xbf16>, vector<128x128xf32> -> vector<128x128xf32>
    %c0_30 = arith.constant 0 : index
    %c0_31 = arith.constant 0 : index
    %61 = vector.load %arg10[%c0_30, %c0_31] : memref<1x128xf32, #tpu.memory_space<vmem>>, vector<1x128xf32>
    %62 = vector.broadcast %61 : vector<1x128xf32> to vector<128x128xf32>
    %63 = arith.addf %60, %62 : vector<128x128xf32>
    %64 = arith.extf %9 : vector<128x128xbf16> to vector<128x128xf32>
    %65 = arith.addf %63, %64 : vector<128x128xf32>
    %cst_32 = arith.constant 0.000000e+00 : f32
    %66 = vector.broadcast %cst_32 : f32 to vector<128x128xf32>
    %67 = arith.maximumf %65, %66 : vector<128x128xf32>
    %68 = vector.shape_cast %67 : vector<128x128xf32> to vector<1x8x16x128xf32>
    %c0_33 = arith.constant 0 : index
    %c0_34 = arith.constant 0 : index
    %c0_35 = arith.constant 0 : index
    %c0_36 = arith.constant 0 : index
    %69 = vector.load %arg11[%c0_33, %c0_34, %c0_35, %c0_36] : memref<1x8x16x128xf32, #tpu.memory_space<vmem>>, vector<1x8x16x128xf32>
    tpu.vector_store %arg11[%c0_33, %c0_34, %c0_35, %c0_36], %68 {strides = array<i32>} : memref<1x8x16x128xf32, #tpu.memory_space<vmem>>, vector<1x8x16x128xf32>,
    return
  }
  func.func @transform_0(%arg0: i32, %arg1: i32) -> (i32, i32, i32, i32) {
    %c0_i32 = arith.constant 0 : i32
    %c0_i32_0 = arith.constant 0 : i32
    %c0_i32_1 = arith.constant 0 : i32
    return %arg0, %arg1, %c0_i32, %c0_i32_0 : i32, i32, i32, i32
  }
  func.func @transform_1(%arg0: i32, %arg1: i32) -> (i32, i32, i32, i32) {
    %c8_i32 = arith.constant 8 : i32
    %0 = arith.muli %arg1, %c8_i32 : i32
    %c1_i32 = arith.constant 1 : i32
    %1 = arith.subi %0, %c1_i32 : i32
    %c0_i32 = arith.constant 0 : i32
    %2 = arith.maxsi %1, %c0_i32 : i32
    %c0_i32_0 = arith.constant 0 : i32
    %c0_i32_1 = arith.constant 0 : i32
    %c0_i32_2 = arith.constant 0 : i32
    return %arg0, %2, %c0_i32_0, %c0_i32_1 : i32, i32, i32, i32
  }
  func.func @transform_2(%arg0: i32, %arg1: i32) -> (i32, i32, i32, i32) {
    %c1_i32 = arith.constant 1 : i32
    %0 = arith.addi %arg1, %c1_i32 : i32
    %c8_i32 = arith.constant 8 : i32
    %1 = arith.muli %0, %c8_i32 : i32
    %c15_i32 = arith.constant 15 : i32
    %2 = arith.minsi %1, %c15_i32 : i32
    %c0_i32 = arith.constant 0 : i32
    %c0_i32_0 = arith.constant 0 : i32
    %c0_i32_1 = arith.constant 0 : i32
    return %arg0, %2, %c0_i32, %c0_i32_0 : i32, i32, i32, i32
  }
  func.func @transform_3(%arg0: i32, %arg1: i32) -> (i32, i32) {
    %c0_i32 = arith.constant 0 : i32
    %c0_i32_0 = arith.constant 0 : i32
    %c0_i32_1 = arith.constant 0 : i32
    return %c0_i32, %c0_i32_0 : i32, i32
  }
  func.func @transform_4(%arg0: i32, %arg1: i32) -> (i32, i32) {
    %c0_i32 = arith.constant 0 : i32
    %c0_i32_0 = arith.constant 0 : i32
    %c0_i32_1 = arith.constant 0 : i32
    return %c0_i32, %c0_i32_0 : i32, i32
  }
  func.func @transform_5(%arg0: i32, %arg1: i32) -> (i32, i32) {
    %c0_i32 = arith.constant 0 : i32
    %c0_i32_0 = arith.constant 0 : i32
    %c0_i32_1 = arith.constant 0 : i32
    return %c0_i32, %c0_i32_0 : i32, i32
  }
  func.func @transform_6(%arg0: i32, %arg1: i32) -> (i32, i32) {
    %c0_i32 = arith.constant 0 : i32
    %c0_i32_0 = arith.constant 0 : i32
    %c0_i32_1 = arith.constant 0 : i32
    return %c0_i32, %c0_i32_0 : i32, i32
  }
  func.func @transform_7(%arg0: i32, %arg1: i32) -> (i32, i32) {
    %c0_i32 = arith.constant 0 : i32
    %c0_i32_0 = arith.constant 0 : i32
    %c0_i32_1 = arith.constant 0 : i32
    return %c0_i32, %c0_i32_0 : i32, i32
  }
  func.func @transform_8(%arg0: i32, %arg1: i32) -> (i32, i32) {
    %c0_i32 = arith.constant 0 : i32
    %c0_i32_0 = arith.constant 0 : i32
    %c0_i32_1 = arith.constant 0 : i32
    return %c0_i32, %c0_i32_0 : i32, i32
  }
  func.func @transform_9(%arg0: i32, %arg1: i32) -> (i32, i32, i32, i32) {
    %c0_i32 = arith.constant 0 : i32
    %c0_i32_0 = arith.constant 0 : i32
    %c0_i32_1 = arith.constant 0 : i32
    return %arg0, %arg1, %c0_i32, %c0_i32_0 : i32, i32, i32, i32
  }
}

</mosaic_0001>

<bundles_post_ra>
// kernel: bottleneck_forward.1
= control target key start
LH: loop header
LB: loop body
LE: loop exit
PB: predicated region body
PF: predicated region fallthrough
CT: control target
= control target key end

     0   :  { %s3187_s30 = smov 0   ;;  %s3189_s10 = smov 0   ;;  %s4027_s0 = inlined_call_operand.vmem [shape: bf16[2,16,16,128], index: 0, kind: input, shape index: {}, may-alias: {0,1,2}]   ;;  %s4028_s1 = inlined_call_operand.vmem [shape: bf16[2,16,16,128], index: 1, kind: input, shape index: {}, may-alias: {0,1,2}]   ;;  %s4029_s2 = inlined_call_operand.vmem [shape: bf16[2,16,16,128], index: 2, kind: input, shape index: {}, may-alias: {0,1,2}]   ;;  %s4030_s3 = inlined_call_operand.vmem [shape: bf16[128,128], index: 3, kind: input, shape index: {}]   ;;  %s4031_s4 = inlined_call_operand.vmem [shape: f32[1,128], index: 4, kind: input, shape index: {}]   ;;  %s4032_s5 = inlined_call_operand.vmem [shape: bf16[1152,128], index: 5, kind: input, shape index: {}]   ;;  %s4033_s6 = inlined_call_operand.vmem [shape: f32[1,128], index: 6, kind: input, shape index: {}]   ;;  %s4034_s7 = inlined_call_operand.vmem [shape: bf16[128,128], index: 7, kind: input, shape index: {}]   ;;  %s4035_s8 = inlined_call_operand.vmem [shape: f32[1,128], index: 8, kind: input, shape index: {}]   ;;  %s4036_s9 = inlined_call_operand.vmem [shape: f32[2,16,16,128], index: 9, kind: output, shape index: {}]  }
   0x1   :  { %s3191_s11 = smov 0   ;;  %s3193_s12 = smov 0  }
   0x2   :  { %s3195_s13 = smov 0  }
   0x3 LB: > { %s28_s14 = sadd.s32 1, %s3127_s11  ;;  %s31_s15 = sadd.s32 1, %s3131_s12  ;;  %s3135_s13 = sphi %s3195_s13, %s19_s13   ;;  %s3131_s12 = sphi %s3193_s12, %s4043_s12   ;;  %s3127_s11 = sphi %s3191_s11, %s4042_s11   ;;  %s3123_s10 = sphi %s3189_s10, %s4041_s10   ;;  %s3119_s30 = sphi %s3187_s30, %s4040_s30  }
   0x4   : > { %p29_p0 = scmp.ge.s32.totalorder %s28_s14, 2  ;;  %p2511_p1 = scmp.ge.s32.totalorder %s3135_s13, 1 }
   0x5   : > { %p373_p2 = scmp.lt.s32.totalorder %s3135_s13, 5 }
   0x6   : > { %s4045_s14 = smov (%p29_p0, %s28_s14), 0  ;;  %s4047_s15 = smov (!%p29_p0, %s31_s15), %s3131_s12 }
   0x7   : > { %p374_p3 = pnand %p2511_p1, %p373_p2  ;;  %p33_p4 = scmp.ge.s32.totalorder %s4047_s15, 2 }
   0x8   : > { %s3225_s18 = sshll.u32 (!%p374_p3), %s3119_s30, 3  ;;  %p446_p6 = scmp.lt.s32.totalorder (!%p374_p3), %s3123_s10, 1 }
   0x9   : > { %s4049_s15 = smov (%p33_p4, %s4047_s15), 0  ;;  %377 = sbr.rel (%p374_p3) target bundleno = 861 (0x35d), region = 56 }
   0xa   : > { %s2517_s21 = sadd.s32 (!%p374_p3), 4294967295, %s3225_s18  ;;  %p448_p7 = scmp.lt.s32.totalorder (!%p374_p3), %s3225_s18, 15 }
   0xb   : > { %p458_p5 = scmp.gt.s32.totalorder (!%p374_p3), %s2517_s21, 0  ;;  %p2518_p8 = scmp.lt.s32.totalorder (!%p374_p3), %s2517_s21, 15 }
   0xc   : > { %p502_p9 = scmp.gt.s32.totalorder (!%p374_p3), %s3119_s30, 0  ;;  %p505_p11 = scmp.lt.s32.totalorder (!%p374_p3), %s3119_s30, 1 }
   0xe   : > { %v2946_v0 = vld [vmem:[%s4030_s3 + $0x38] sm:$0xff]  ;;  %v2945_v1 = vld [vmem:[%s4030_s3 + $0x30] sm:$0xff]  ;;  %v2944_v2 = vld [vmem:[%s4030_s3 + $0x28] sm:$0xff]  ;;  %s4051_s21 = smov (!%p458_p5, %s2517_s21), 0  ;;  %s4053_s10 = smov (!%p446_p6, %s3123_s10), 1  ;;  %vm919_vm0 = vcmask 1040384  }
   0xf   : > { %640 = vmatpush.bf16.msra.mxu0 %v2946_v0  ;;  %729 = vmatpush.bf16.msra.mxu1 %v2946_v0  ;;  %v2943_v3 = vld [vmem:[%s4030_s3 + $0x20] sm:$0xff]  ;;  %s449_s26 = scalar_select %p448_p7, %s3225_s18, 15  ;;  %v2942_v4 = vld [vmem:[%s4030_s3 + $0x18] sm:$0xff]  ;;  %v2941_v5 = vld [vmem:[%s4030_s3 + $0x10] sm:$0xff]  ;;  %vm920_vm1 = vsmask.f32 256 }
  0x10   : > { %758 = vmatpush.bf16.msra.mxu2 %v2946_v0  ;;  %s4055_s21 = smov (!%p2518_p8, %s4051_s21), 15  ;;  %s3244_s29 = sshll.u32 %s4053_s10, 5  ;;  %v2940_v6 = vld [vmem:[%s4030_s3 + $0x8] sm:$0xff]  ;;  %v2939_v7 = vld [vmem:[%s4030_s3] sm:$0xff]  ;;  %v2988_v15 = vld [vmem:[%s4032_s5 + $0xf8] sm:$0xff]  ;;  %vm1093_vm3 = vcmask 1046528  }
  0x11   : > { %s2513_s16 = sshll.u32 %s449_s26, 1  ;;  %s2523_s17 = sshll.u32 %s4055_s21, 1  ;;  %v2964_v16 = vld [vmem:[%s4032_s5 + $0x38] sm:$0xff]  ;;  %v2987_v17 = vld [vmem:[%s4032_s5 + $0xf0] sm:$0xff]  ;;  %v2986_v20 = vld [vmem:[%s4032_s5 + $0xe8] sm:$0xff] }
  0x12   : > { %s3250_s22 = sadd.s32 %s3244_s29, %s2513_s16  ;;  %s466_s23 = sadd.s32 %s2523_s17, %s3244_s29  ;;  %1714 = vmatpush.bf16.msra.mxu3 %v2964_v16  ;;  %v2963_v19 = vld [vmem:[%s4032_s5 + $0x30] sm:$0xff]  ;;  %v2972_v21 = vld [vmem:[%s4032_s5 + $0x78] sm:$0xff]  ;;  %v2962_v22 = vld [vmem:[%s4032_s5 + $0x28] sm:$0xff]  ;;  %vm942_vm4 = vsmask.f32 7424 }
  0x13   : > { %641 = vmatpush.bf16.msra.mxu0 %v2945_v1  ;;  %730 = vmatpush.bf16.msra.mxu1 %v2945_v1  ;;  %s2515_s25 = sshll.u32 %s3250_s22, 2  ;;  %s2525_s26 = sshll.u32 %s466_s23, 2  ;;  %v2985_v23 = vld [vmem:[%s4032_s5 + $0xe0] sm:$0xff]  ;;  %v2971_v24 = vld [vmem:[%s4032_s5 + $0x70] sm:$0xff]  ;;  %v2984_v26 = vld [vmem:[%s4032_s5 + $0xd8] sm:$0xff] }
  0x14   : > { %759 = vmatpush.bf16.msra.mxu2 %v2945_v1  ;;  %s3263_s19 = scalar_lea.vmem %s4027_s0, %s2515_s25  ;;  %s468_s23 = scalar_lea.vmem %s4028_s1, %s2525_s26  ;;  %v2961_v25 = vld [vmem:[%s4032_s5 + $0x20] sm:$0xff]  ;;  %v2970_v27 = vld [vmem:[%s4032_s5 + $0x68] sm:$0xff]  ;;  %v2960_v28 = vld [vmem:[%s4032_s5 + $0x18] sm:$0xff] }
  0x15   : > { %v2947_v8 = vld [vmem:[%s3263_s19] sm:$0xff]  ;;  %v2948_v10 = vld [vmem:[%s3263_s19 + $0x8] sm:$0xff]  ;;  %v2949_v11 = vld [vmem:[%s3263_s19 + $0x10] sm:$0xff]  ;;  %s503_s25 = scalar_select %p502_p9, 1, 0 }
  0x16   : > { %v2955_v9 = vld [vmem:[%s468_s23] sm:$0xff]  ;;  %v2950_v12 = vld [vmem:[%s3263_s19 + $0x18] sm:$0xff]  ;;  %v2952_v14 = vld [vmem:[%s3263_s19 + $0x28] sm:$0xff]  ;;  %1715 = vmatpush.bf16.msra.mxu3 %v2963_v19  ;;  %s2938_s23 = sadd.s32 8, %s3225_s18  ;;  %s2536_s27 = sshll.u32 %s3250_s22, 3 }
  0x17   : > { %642 = vmatpush.bf16.msra.mxu0 %v2944_v2  ;;  %731 = vmatpush.bf16.msra.mxu1 %v2944_v2  ;;  %v2951_v13 = vld [vmem:[%s3263_s19 + $0x20] sm:$0xff]  ;;  %v2953_v18 = vld [vmem:[%s3263_s19 + $0x30] sm:$0xff]  ;;  %v2954_v31 = vld [vmem:[%s3263_s19 + $0x38] sm:$0xff]  ;;  %s504_s16 = scvt.s32.f32 %s503_s25  ;;  %p3362_p10 = scmp.lt.s32.totalorder %s2938_s23, 15 }
  0x18   : > { %760 = vmatpush.bf16.msra.mxu2 %v2944_v2  ;;  %v2983_v29 = vld [vmem:[%s4032_s5 + $0xd0] sm:$0xff]  ;;  %v2969_v30 = vld [vmem:[%s4032_s5 + $0x60] sm:$0xff]  ;;  %v2982_v33 = vld [vmem:[%s4032_s5 + $0xc8] sm:$0xff]  ;;  %s3972_s17 = scalar_lea.vmem %s4036_s9, %s2536_s27 }
  0x19   : > { %v2959_v32 = vld [vmem:[%s4032_s5 + $0x10] sm:$0xff]  ;;  %v2968_v34 = vld [vmem:[%s4032_s5 + $0x58] sm:$0xff]  ;;  %v2958_v35 = vld [vmem:[%s4032_s5 + $0x8] sm:$0xff]  ;;  %v745_v47 = vstv %s504_s16  ;;  %s4057_s23 = smov (!%p3362_p10, %s2938_s23), 15 }
  0x1a   : > { %1716 = vmatpush.bf16.msra.mxu3 %v2962_v22  ;;  %v2981_v36 = vld [vmem:[%s4032_s5 + $0xc0] sm:$0xff]  ;;  %v2967_v37 = vld [vmem:[%s4032_s5 + $0x50] sm:$0xff]  ;;  %v2966_v39 = vld [vmem:[%s4032_s5 + $0x48] sm:$0xff]  ;;  %s4059_s23 = smov (!%p3362_p10, %s4057_s23), 15 }
  0x1b   : > { %643 = vmatpush.bf16.msra.mxu0 %v2943_v3  ;;  %732 = vmatpush.bf16.msra.mxu1 %v2943_v3  ;;  %v2957_v38 = vld [vmem:[%s4032_s5] sm:$0xff]  ;;  %v2996_v50 = vld [vmem:[%s4032_s5 + $0x138] sm:$0xff]  ;;  %vm3371_vm2 = vmand %vm919_vm0, %vm920_vm1  ;;  %s2530_s25 = sshll.u32 %s4059_s23, 1 }
  0x1c   : > { %761 = vmatpush.bf16.msra.mxu2 %v2943_v3  ;;  %v2965_v40 = vld [vmem:[%s4032_s5 + $0x40] sm:$0xff]  ;;  %s483_s26 = sadd.s32 %s2530_s25, %s3244_s29 }
  0x1d   : > { %v3352_v41 = vld [vmem:[%s4031_s4] ss:$0 sm:$0xff]  ;;  %s2532_s21 = sshll.u32 %s483_s26, 2 }
  0x1e   : > { %1717 = vmatpush.bf16.msra.mxu3 %v2961_v25  ;;  %s485_s28 = scalar_lea.vmem %s4029_s2, %s2532_s21 }
  0x1f   : > { %644 = vmatpush.bf16.msra.mxu0 %v2942_v4  ;;  %733 = vmatpush.bf16.msra.mxu1 %v2942_v4  ;;  %s506_s16 = scalar_select %p505_p11, 1, 0 }
  0x20   : > { %762 = vmatpush.bf16.msra.mxu2 %v2942_v4 }
  0x21   : > { %s507_s30 = scvt.s32.f32 %s506_s16 }
  0x22   : > { %1718 = vmatpush.bf16.msra.mxu3 %v2960_v28 }
  0x23   : > { %645 = vmatpush.bf16.msra.mxu0 %v2941_v5  ;;  %734 = vmatpush.bf16.msra.mxu1 %v2941_v5 }
  0x24   : > { %763 = vmatpush.bf16.msra.mxu2 %v2941_v5 }
  0x26   : > { %1719 = vmatpush.bf16.msra.mxu3 %v2959_v32 }
  0x27   : > { %646 = vmatpush.bf16.msra.mxu0 %v2940_v6  ;;  %735 = vmatpush.bf16.msra.mxu1 %v2940_v6 }
  0x28   : > { %764 = vmatpush.bf16.msra.mxu2 %v2940_v6 }
  0x2a   : > { %1720 = vmatpush.bf16.msra.mxu3 %v2958_v35 }
  0x2b   : > { %647 = vmatpush.bf16.msra.mxu0 %v2939_v7  ;;  %736 = vmatpush.bf16.msra.mxu1 %v2939_v7 }
  0x2c   : > { %765 = vmatpush.bf16.msra.mxu2 %v2939_v7 }
  0x2e   : > { %648 = vmatmul.bf16.vlgmr.msra.gmra.mxu0 %v2947_v8  ;;  %737 = vmatmul.bf16.vlgmr.msra.gmra.mxu1 %v2955_v9 }
  0x2f   : > { %1861 = vmatpush.bf16.msrb.mxu0 %v2988_v15  ;;  %1763 = vmatpush.bf16.msrb.mxu1 %v2972_v21  ;;  %v2995_v15 = vld [vmem:[%s4032_s5 + $0x130] sm:$0xff] }
  0x30   : > { %3037 = vmatpush.bf16.msrb.mxu2 %v2972_v21  ;;  %1721 = vmatpush.bf16.msra.mxu3 %v2957_v38 }
  0x33   : > { %1862 = vmatpush.bf16.msrb.mxu0 %v2987_v17  ;;  %1764 = vmatpush.bf16.msrb.mxu1 %v2971_v24 }
  0x34   : > { %3038 = vmatpush.bf16.msrb.mxu2 %v2971_v24  ;;  %1910 = vmatpush.bf16.msrb.mxu3 %v2996_v50 }
  0x37   : > { %1863 = vmatpush.bf16.msrb.mxu0 %v2986_v20  ;;  %1765 = vmatpush.bf16.msrb.mxu1 %v2970_v27 }
  0x38   : > { %3039 = vmatpush.bf16.msrb.mxu2 %v2970_v27  ;;  %1911 = vmatpush.bf16.msrb.mxu3 %v2995_v15  ;;  %v3003_v15 = vld [vmem:[%s4032_s5 + $0x170] sm:$0xff] }
  0x3b   : > { %1864 = vmatpush.bf16.msrb.mxu0 %v2985_v23  ;;  %1766 = vmatpush.bf16.msrb.mxu1 %v2969_v30 }
  0x3c   : > { %3040 = vmatpush.bf16.msrb.mxu2 %v2969_v30 }
  0x3e   : > { %653 = vmatmul.bf16.gmra.mxu0 %v2948_v10 }
  0x3f   : > { %1865 = vmatpush.bf16.msrb.mxu0 %v2984_v26  ;;  %1767 = vmatpush.bf16.msrb.mxu1 %v2968_v34 }
  0x40   : > { %3041 = vmatpush.bf16.msrb.mxu2 %v2968_v34 }
  0x43   : > { %1866 = vmatpush.bf16.msrb.mxu0 %v2983_v29  ;;  %1768 = vmatpush.bf16.msrb.mxu1 %v2967_v37 }
  0x44   : > { %3042 = vmatpush.bf16.msrb.mxu2 %v2967_v37 }
  0x47   : > { %1867 = vmatpush.bf16.msrb.mxu0 %v2982_v33  ;;  %1769 = vmatpush.bf16.msrb.mxu1 %v2966_v39 }
  0x48   : > { %3043 = vmatpush.bf16.msrb.mxu2 %v2966_v39 }
  0x4b   : > { %1868 = vmatpush.bf16.msrb.mxu0 %v2981_v36  ;;  %1770 = vmatpush.bf16.msrb.mxu1 %v2965_v40 }
  0x4c   : > { %3044 = vmatpush.bf16.msrb.mxu2 %v2965_v40 }
  0x4e   : > { %658 = vmatmul.bf16.gmra.mxu0 %v2949_v11 }
  0x5e   : > { %663 = vmatmul.bf16.gmra.mxu0 %v2950_v12 }
  0x6e   : > { %668 = vmatmul.bf16.gmra.mxu0 %v2951_v13 }
  0x7e   : > { %673 = vmatmul.bf16.gmra.mxu0 %v2952_v14 }
  0x8e   : > { %678 = vmatmul.bf16.gmra.mxu0 %v2953_v18 }
  0x9e   : > { %683 = vmatmul.bf16.gmra.mxu0 %v2954_v31 }
  0xab   : > { %v649_v42 = vpop.f32.mrf.mxu0  ;;  %v738_v43 = vpop.f32.mrf.mxu1 }
  0xac   : > { %v739_v44 = vadd.f32 %v3352_v41, %v738_v43  ;;  %v650_v45 = vadd.f32 %v3352_v41, %v649_v42 }
  0xae   : > { %v743_v46 = vmax.f32 %v739_v44, 0.0  ;;  %v689_v48 = vmax.f32 %v650_v45, 0.0 }
  0xb0   : > { %v746_v49 = vmul.f32 %v745_v47, %v743_v46  ;;  %v705_v55 = vpack.c.bf16 %v689_v48, %v689_v48  ;;  %v2956_v46 = vld [vmem:[%s485_s28] sm:$0xff] }
  0xb1   : > { %766 = vmatmul.bf16.vlgmr.msra.gmra.mxu2 %v2956_v46  ;;  %v2980_v46 = vld [vmem:[%s4032_s5 + $0xb8] sm:$0xff] }
  0xb2   : > { %v748_v56 = vpack.c.bf16 %v746_v49, %v746_v49  ;;  %v801_v61 = vunpack.c.l.b16 %v705_v55  ;;  %1812 = vmatpush.bf16.msra.mxu2 %v2980_v46 }
  0xb3   : > { %v651_v51 = vpop.f32.mrf.mxu0  ;;  %v740_v52 = vpop.f32.mrf.mxu1 }
  0xb4   : > { %v652_v53 = vadd.f32 %v3352_v41, %v651_v51  ;;  %v741_v54 = vadd.f32 %v3352_v41, %v740_v52  ;;  %v799_v62 = vunpack.c.l.b16 %v748_v56  ;;  %v2994_v52 = vld [vmem:[%s4032_s5 + $0x128] sm:$0xff] }
  0xb5   : > { %1912 = vmatpush.bf16.msrb.mxu3 %v2994_v52 }
  0xb6   : > { %v690_v57 = vmax.f32 %v652_v53, 0.0  ;;  %v744_v58 = vmax.f32 %v741_v54, 0.0 }
  0xb8   : > { %v706_v59 = vpack.c.bf16 %v690_v57, %v690_v57  ;;  %v747_v60 = vmul.f32 %v745_v47, %v744_v58 }
  0xba   : > { %v802_v63 = vunpack.c.l.b16 %v706_v59  ;;  %v749_v0 = vpack.c.bf16 %v747_v60, %v747_v60 }
  0xbb   : > { %v654_v1 = vpop.f32.mrf.mxu0 }
  0xbc   : > { %v820_v2 = vpack.c.b16 %v802_v63, %v801_v61  ;;  %v800_v3 = vunpack.c.l.b16 %v749_v0  ;;  %v655_v4 = vadd.f32 %v3352_v41, %v654_v1 }
  0xbe   : > { %v837_v5 = vshrl.u32 %v820_v2, 16  ;;  %v819_v6 = vpack.c.b16 %v800_v3, %v799_v62  ;;  %v840_v8 = vshll.u32 %v820_v2, 16  ;;  %v691_v11 = vmax.f32 %v655_v4, 0.0 }
  0xc0   : > { %v839_v7 = vrot.slane %v837_v5, 7  ;;  %v830_v10 = vshrl.u32 %v819_v6, 16  ;;  %v833_v14 = vshll.u32 %v819_v6, 16  ;;  %v707_v22 = vpack.c.bf16 %v691_v11, %v691_v11 }
  0xc2   : > { %v842_v12 = vor.u32 %v840_v8, %v839_v7  ;;  %v832_v13 = vrot.slane %v830_v10, 7  ;;  %v933_v17 = vsel %vm3371_vm2, %v839_v7, 0  ;;  %v803_v36 = vunpack.c.l.b16 %v707_v22  ;;  %v3004_v7 = vld [vmem:[%s4032_s5 + $0x178] sm:$0xff] }
  0xc3   : > { %v656_v16 = vpop.f32.mrf.mxu0  ;;  %v1098_v25 = vrot.slane %v933_v17, 1  ;;  %v963_v60 = vshll.u32 %v933_v17, 16  ;;  %1959 = vmatpush.bf16.msra.mxu1 %v3004_v7 }
  0xc4   : > { %v657_v18 = vadd.f32 %v3352_v41, %v656_v16  ;;  %v923_v19 = vsel %vm3371_vm2, 0, %v842_v12  ;;  %v835_v20 = vor.u32 %v833_v14, %v832_v13  ;;  %v932_v21 = vsel %vm3371_vm2, %v832_v13, 0  ;;  %v2993_v14 = vld [vmem:[%s4032_s5 + $0x120] sm:$0xff] }
  0xc5   : > { %1869 = vmatmul.bf16.vlgmr.msrb.gmra.mxu0 %v923_v19  ;;  %v1097_v26 = vrot.slane %v923_v19, 1  ;;  %v951_v29 = vshll.u32 %v932_v21, 16  ;;  %v1095_v30 = vrot.slane %v932_v21, 1  ;;  %v958_v49 = vshll.u32 %v923_v19, 16  ;;  %1913 = vmatpush.bf16.msrb.mxu3 %v2993_v14 }
  0xc6   : > { %v692_v23 = vmax.f32 %v657_v18, 0.0  ;;  %v922_v24 = vsel %vm3371_vm2, 0, %v835_v20  ;;  %v956_v59 = vshrl.u32 %v923_v19, 16  ;;  %v965_v2 = vrot.slane %v963_v60, 1 }
  0xc7   : > { %v946_v27 = vshll.u32 %v922_v24, 16  ;;  %v1094_v28 = vrot.slane %v922_v24, 1  ;;  %1722 = vmatmul.bf16.vlgmr.msra.gmra.mxu3 %v922_v24  ;;  %v3389_v32 = vsel %vm1093_vm3, %v1097_v26, %v1098_v25  ;;  %v944_v33 = vshrl.u32 %v922_v24, 16  ;;  %1960 = vmatpush.bf16.msra.mxu1 %v3003_v15 }
  0xc8   : > { %v708_v31 = vpack.c.bf16 %v692_v23, %v692_v23  ;;  %v953_v40 = vrot.slane %v951_v29, 1  ;;  %v960_v56 = vrot.slane %v958_v49, 1  ;;  %v3002_v23 = vld [vmem:[%s4032_s5 + $0x168] sm:$0xff]  ;;  %v2999_v49 = vld [vmem:[%s4032_s5 + $0x150] sm:$0xff] }
  0xc9   : > { %v948_v34 = vrot.slane %v946_v27, 1  ;;  %v3392_v35 = vsel %vm1093_vm3, %v1094_v28, %v1095_v30  ;;  %v3001_v30 = vld [vmem:[%s4032_s5 + $0x160] sm:$0xff] }
  0xca   : > { %v804_v37 = vunpack.c.l.b16 %v708_v31  ;;  %v961_v62 = vor.u32 %v960_v56, %v956_v59 }
  0xcb   : > { %v659_v38 = vpop.f32.mrf.mxu0  ;;  %v949_v39 = vor.u32 %v948_v34, %v944_v33  ;;  %1961 = vmatpush.bf16.msra.mxu1 %v3002_v23 }
  0xcc   : > { %v821_v42 = vpack.c.b16 %v804_v37, %v803_v36  ;;  %v660_v45 = vadd.f32 %v3352_v41, %v659_v38  ;;  %v3409_v4 = vsel %vm942_vm4, %v961_v62, %v965_v2 }
  0xcd   : > { %v954_v43 = vsel %vm942_vm4, %v949_v39, %v953_v40  ;;  %v3000_v39 = vld [vmem:[%s4032_s5 + $0x158] sm:$0xff] }
  0xce   : > { %v844_v44 = vshrl.u32 %v821_v42, 16  ;;  %1771 = vmatmul.bf16.vlgmr.msrb.gmra.mxu1 %v954_v43  ;;  %v847_v48 = vshll.u32 %v821_v42, 16  ;;  %v693_v51 = vmax.f32 %v660_v45, 0.0 }
  0xcf   : > { %1962 = vmatpush.bf16.msra.mxu1 %v3001_v30 }
  0xd0   : > { %v846_v47 = vrot.slane %v844_v44, 7  ;;  %v709_v57 = vpack.c.bf16 %v693_v51, %v693_v51 }
  0xd2   : > { %v849_v50 = vor.u32 %v847_v48, %v846_v47  ;;  %v805_v63 = vunpack.c.l.b16 %v709_v57 }
  0xd3   : > { %v661_v53 = vpop.f32.mrf.mxu0  ;;  %1963 = vmatpush.bf16.msra.mxu1 %v3000_v39 }
  0xd4   : > { %v662_v54 = vadd.f32 %v3352_v41, %v661_v53  ;;  %v3405_v55 = vsel %vm3371_vm2, 0, %v849_v50  ;;  %v2979_v53 = vld [vmem:[%s4032_s5 + $0xb0] sm:$0xff] }
  0xd5   : > { %1874 = vmatmul.bf16.gmra.mxu0 %v3405_v55  ;;  %v970_v11 = vshll.u32 %v3405_v55, 16  ;;  %v968_v24 = vshrl.u32 %v3405_v55, 16  ;;  %1813 = vmatpush.bf16.msra.mxu2 %v2979_v53 }
  0xd6   : > { %v694_v58 = vmax.f32 %v662_v54, 0.0 }
  0xd7   : > { %1727 = vmatmul.bf16.gmra.mxu3 %v923_v19  ;;  %v3430_v19 = vsel %vm3371_vm2, %v846_v47, 0  ;;  %v972_v20 = vrot.slane %v970_v11, 1  ;;  %v2992_v47 = vld [vmem:[%s4032_s5 + $0x118] sm:$0xff]  ;;  %1964 = vmatpush.bf16.msra.mxu1 %v2999_v49 }
  0xd8   : > { %v710_v61 = vpack.c.bf16 %v694_v58, %v694_v58  ;;  %v975_v25 = vshll.u32 %v3430_v19, 16  ;;  %1914 = vmatpush.bf16.msrb.mxu3 %v2992_v47  ;;  %v2998_v58 = vld [vmem:[%s4032_s5 + $0x148] sm:$0xff] }
  0xd9   : > { %v973_v27 = vor.u32 %v972_v20, %v968_v24  ;;  %v2977_v24 = vld [vmem:[%s4032_s5 + $0xa0] sm:$0xff] }
  0xda   : > { %v806_v0 = vunpack.c.l.b16 %v710_v61  ;;  %v977_v33 = vrot.slane %v975_v25, 1 }
  0xdb   : > { %v664_v1 = vpop.f32.mrf.mxu0  ;;  %1965 = vmatpush.bf16.msra.mxu1 %v2998_v58 }
  0xdc   : > { %v822_v3 = vpack.c.b16 %v806_v0, %v805_v63  ;;  %v665_v6 = vadd.f32 %v3352_v41, %v664_v1  ;;  %v3443_v36 = vsel %vm942_vm4, %v973_v27, %v977_v33  ;;  %v2997_v1 = vld [vmem:[%s4032_s5 + $0x140] sm:$0xff] }
  0xde   : > { %v851_v5 = vshrl.u32 %v822_v3, 16  ;;  %1776 = vmatmul.bf16.gmra.mxu1 %v3409_v4  ;;  %v854_v10 = vshll.u32 %v822_v3, 16  ;;  %v695_v13 = vmax.f32 %v665_v6, 0.0 }
  0xdf   : > { %1966 = vmatpush.bf16.msra.mxu1 %v2997_v1 }
  0xe0   : > { %v853_v8 = vrot.slane %v851_v5, 7  ;;  %v711_v21 = vpack.c.bf16 %v695_v13, %v695_v13 }
  0xe2   : > { %v856_v12 = vor.u32 %v854_v10, %v853_v8  ;;  %v807_v28 = vunpack.c.l.b16 %v711_v21  ;;  %v3467_v52 = vsel %vm3371_vm2, %v853_v8, 0 }
  0xe3   : > { %v666_v16 = vpop.f32.mrf.mxu0  ;;  %v987_v60 = vshll.u32 %v3467_v52, 16 }
  0xe4   : > { %v667_v17 = vadd.f32 %v3352_v41, %v666_v16  ;;  %v3426_v18 = vsel %vm3371_vm2, 0, %v856_v12  ;;  %v2978_v16 = vld [vmem:[%s4032_s5 + $0xa8] sm:$0xff] }
  0xe5   : > { %1879 = vmatmul.bf16.gmra.mxu0 %v3426_v18  ;;  %v982_v43 = vshll.u32 %v3426_v18, 16  ;;  %v980_v59 = vshrl.u32 %v3426_v18, 16  ;;  %v989_v3 = vrot.slane %v987_v60, 1  ;;  %1814 = vmatpush.bf16.msra.mxu2 %v2978_v16  ;;  %v2975_v60 = vld [vmem:[%s4032_s5 + $0x90] sm:$0xff] }
  0xe6   : > { %v696_v22 = vmax.f32 %v667_v17, 0.0  ;;  %v2991_v17 = vld [vmem:[%s4032_s5 + $0x110] sm:$0xff] }
  0xe7   : > { %1732 = vmatmul.bf16.gmra.mxu3 %v3405_v55  ;;  %v984_v54 = vrot.slane %v982_v43, 1  ;;  %v3526_v43 = vld [vmem:[%s4032_s5 + $0x1f0] sm:$0xff] }
  0xe8   : > { %v712_v26 = vpack.c.bf16 %v696_v22, %v696_v22  ;;  %1915 = vmatpush.bf16.msrb.mxu3 %v2991_v17 }
  0xe9   : > { %v985_v62 = vor.u32 %v984_v54, %v980_v59  ;;  %1815 = vmatpush.bf16.msra.mxu2 %v2977_v24  ;;  %v3542_v54 = vld [vmem:[%s4032_s5 + $0x1e8] sm:$0xff] }
  0xea   : > { %v808_v29 = vunpack.c.l.b16 %v712_v26 }
  0xeb   : > { %v669_v31 = vpop.f32.mrf.mxu0  ;;  %v3483_v6 = vsel %vm942_vm4, %v985_v62, %v989_v3  ;;  %v3556_v62 = vld [vmem:[%s4032_s5 + $0x1e0] sm:$0xff] }
  0xec   : > { %v823_v34 = vpack.c.b16 %v808_v29, %v807_v28  ;;  %v670_v38 = vadd.f32 %v3352_v41, %v669_v31  ;;  %v3516_v28 = vld [vmem:[%s4032_s5 + $0x1f8] sm:$0xff] }
  0xed   : > { %2057 = vmatpush.bf16.msra.mxu0 %v3516_v28 }
  0xee   : > { %v858_v37 = vshrl.u32 %v823_v34, 16  ;;  %1781 = vmatmul.bf16.gmra.mxu1 %v3443_v36  ;;  %v861_v42 = vshll.u32 %v823_v34, 16  ;;  %v697_v45 = vmax.f32 %v670_v38, 0.0 }
  0xf0   : > { %v860_v40 = vrot.slane %v858_v37, 7  ;;  %v713_v56 = vpack.c.bf16 %v697_v45, %v697_v45 }
  0xf1   : > { %2058 = vmatpush.bf16.msra.mxu0 %v3526_v43 }
  0xf2   : > { %v863_v44 = vor.u32 %v861_v42, %v860_v40  ;;  %v809_v63 = vunpack.c.l.b16 %v713_v56  ;;  %v3505_v23 = vsel %vm3371_vm2, %v860_v40, 0 }
  0xf3   : > { %v671_v48 = vpop.f32.mrf.mxu0  ;;  %v999_v37 = vshll.u32 %v3505_v23, 16 }
  0xf4   : > { %v672_v50 = vadd.f32 %v3352_v41, %v671_v48  ;;  %v3463_v51 = vsel %vm3371_vm2, 0, %v863_v44 }
  0xf5   : > { %1884 = vmatmul.bf16.gmra.mxu0 %v3463_v51  ;;  %v994_v12 = vshll.u32 %v3463_v51, 16  ;;  %v992_v34 = vshrl.u32 %v3463_v51, 16  ;;  %v1001_v48 = vrot.slane %v999_v37, 1  ;;  %v2989_v37 = vld [vmem:[%s4032_s5 + $0x100] sm:$0xff] }
  0xf6   : > { %v698_v57 = vmax.f32 %v672_v50, 0.0  ;;  %v2976_v50 = vld [vmem:[%s4032_s5 + $0x98] sm:$0xff]  ;;  %2059 = vmatpush.bf16.msra.mxu0 %v3542_v54 }
  0xf7   : > { %1737 = vmatmul.bf16.gmra.mxu3 %v3426_v18  ;;  %v996_v27 = vrot.slane %v994_v12, 1  ;;  %1816 = vmatpush.bf16.msra.mxu2 %v2976_v50 }
  0xf8   : > { %v714_v61 = vpack.c.bf16 %v698_v57, %v698_v57 }
  0xf9   : > { %v997_v42 = vor.u32 %v996_v27, %v992_v34  ;;  %v3012_v34 = vld [vmem:[%s4032_s5 + $0x1b8] sm:$0xff] }
  0xfa   : > { %v810_v0 = vunpack.c.l.b16 %v714_v61  ;;  %v2990_v61 = vld [vmem:[%s4032_s5 + $0x108] sm:$0xff]  ;;  %2060 = vmatpush.bf16.msra.mxu0 %v3556_v62 }
  0xfb   : > { %v674_v2 = vpop.f32.mrf.mxu0  ;;  %v3537_v53 = vsel %vm942_vm4, %v997_v42, %v1001_v48  ;;  %1817 = vmatpush.bf16.msra.mxu2 %v2975_v60  ;;  %1916 = vmatpush.bf16.msrb.mxu3 %v2990_v61 }
  0xfc   : > { %v824_v5 = vpack.c.b16 %v810_v0, %v809_v63  ;;  %v675_v8 = vadd.f32 %v3352_v41, %v674_v2  ;;  %v2974_v2 = vld [vmem:[%s4032_s5 + $0x88] sm:$0xff] }
  0xfe   : > { %v865_v7 = vshrl.u32 %v824_v5, 16  ;;  %1786 = vmatmul.bf16.gmra.mxu1 %v3483_v6  ;;  %v868_v11 = vshll.u32 %v824_v5, 16  ;;  %v699_v14 = vmax.f32 %v675_v8, 0.0 }
  0xff   : > { %1818 = vmatpush.bf16.msra.mxu2 %v2974_v2  ;;  %1917 = vmatpush.bf16.msrb.mxu3 %v2989_v37 }
 0x100   : > { %v867_v10 = vrot.slane %v865_v7, 7  ;;  %v715_v29 = vpack.c.bf16 %v699_v14, %v699_v14  ;;  %v2973_v14 = vld [vmem:[%s4032_s5 + $0x80] sm:$0xff] }
 0x102   : > { %v870_v13 = vor.u32 %v868_v11, %v867_v10  ;;  %v3490_v15 = vsel %vm3371_vm2, %v867_v10, 0  ;;  %v811_v44 = vunpack.c.l.b16 %v715_v29  ;;  %v3577_v11 = vld [vmem:[%s4032_s5 + $0x1d8] sm:$0xff] }
 0x103   : > { %v676_v20 = vpop.f32.mrf.mxu0  ;;  %v1011_v26 = vshll.u32 %v3490_v15, 16  ;;  %2061 = vmatpush.bf16.msra.mxu0 %v3577_v11  ;;  %1819 = vmatpush.bf16.msra.mxu2 %v2973_v14 }
 0x104   : > { %v677_v21 = vadd.f32 %v3352_v41, %v676_v20  ;;  %v3501_v22 = vsel %vm3371_vm2, 0, %v870_v13  ;;  %v3588_v20 = vld [vmem:[%s4032_s5 + $0x1d0] sm:$0xff] }
 0x105   : > { %1889 = vmatmul.bf16.gmra.mxu0 %v3501_v22  ;;  %v1006_v25 = vshll.u32 %v3501_v22, 16  ;;  %v1004_v31 = vshrl.u32 %v3501_v22, 16  ;;  %v1013_v40 = vrot.slane %v1011_v26, 1 }
 0x106   : > { %v700_v30 = vmax.f32 %v677_v21, 0.0 }
 0x107   : > { %1742 = vmatmul.bf16.gmra.mxu3 %v3463_v51  ;;  %v1008_v33 = vrot.slane %v1006_v25, 1  ;;  %2062 = vmatpush.bf16.msra.mxu0 %v3588_v20 }
 0x108   : > { %v716_v38 = vpack.c.bf16 %v700_v30, %v700_v30 }
 0x109   : > { %v1009_v39 = vor.u32 %v1008_v33, %v1004_v31 }
 0x10a   : > { %v812_v45 = vunpack.c.l.b16 %v716_v38  ;;  %v3605_v38 = vld [vmem:[%s4032_s5 + $0x1c8] sm:$0xff] }
 0x10b   : > { %v679_v46 = vpop.f32.mrf.mxu0  ;;  %v3529_v47 = vsel %vm942_vm4, %v1009_v39, %v1013_v40  ;;  %2063 = vmatpush.bf16.msra.mxu0 %v3605_v38 }
 0x10c   : > { %v825_v49 = vpack.c.b16 %v812_v45, %v811_v44  ;;  %1796 = vmatmul.bf16.vlgmr.msrb.gmra.mxu2 %v3529_v47  ;;  %v680_v57 = vadd.f32 %v3352_v41, %v679_v46  ;;  %v3612_v45 = vld [vmem:[%s4032_s5 + $0x1c0] sm:$0xff] }
 0x10d   : > { %2008 = vmatpush.bf16.msrb.mxu2 %v3012_v34  ;;  %v3027_v34 = vld [vmem:[%s4032_s5 + $0x230] sm:$0xff] }
 0x10e   : > { %v872_v56 = vshrl.u32 %v825_v49, 16  ;;  %1791 = vmatmul.bf16.gmra.mxu1 %v3537_v53  ;;  %v875_v59 = vshll.u32 %v825_v49, 16  ;;  %v701_v0 = vmax.f32 %v680_v57, 0.0 }
 0x10f   : > { %2064 = vmatpush.bf16.msra.mxu0 %v3612_v45 }
 0x110   : > { %v874_v58 = vrot.slane %v872_v56, 7  ;;  %v717_v12 = vpack.c.bf16 %v701_v0, %v701_v0 }
 0x112   : > { %v877_v63 = vor.u32 %v875_v59, %v874_v58  ;;  %v3560_v1 = vsel %vm3371_vm2, %v874_v58, 0  ;;  %v813_v26 = vunpack.c.l.b16 %v717_v12  ;;  %v1101_v12 = vrot.slane %v3430_v19, 1 }
 0x113   : > { %v681_v3 = vpop.f32.mrf.mxu0  ;;  %v1023_v10 = vshll.u32 %v3560_v1, 16 }
 0x114   : > { %v682_v5 = vadd.f32 %v3352_v41, %v681_v3  ;;  %v3569_v7 = vsel %vm3371_vm2, 0, %v877_v63 }
 0x115   : > { %1894 = vmatmul.bf16.gmra.mxu0 %v3569_v7  ;;  %v1018_v8 = vshll.u32 %v3569_v7, 16  ;;  %v1016_v16 = vshrl.u32 %v3569_v7, 16  ;;  %v1025_v25 = vrot.slane %v1023_v10, 1 }
 0x116   : > { %v702_v13 = vmax.f32 %v682_v5, 0.0  ;;  %v1100_v5 = vrot.slane %v3405_v55, 1 }
 0x117   : > { %1747 = vmatmul.bf16.gmra.mxu3 %v3501_v22  ;;  %v1020_v17 = vrot.slane %v1018_v8, 1 }
 0x118   : > { %v718_v21 = vpack.c.bf16 %v702_v13, %v702_v13  ;;  %v3636_v14 = vsel %vm1093_vm3, %v1100_v5, %v1101_v12  ;;  %v1112_v5 = vrot.slane %v3569_v7, 1 }
 0x119   : > { %v1021_v24 = vor.u32 %v1020_v17, %v1016_v16  ;;  %v3011_v16 = vld [vmem:[%s4032_s5 + $0x1b0] sm:$0xff] }
 0x11a   : > { %v814_v27 = vunpack.c.l.b16 %v718_v21  ;;  %2009 = vmatpush.bf16.msrb.mxu2 %v3011_v16  ;;  %v1113_v16 = vrot.slane %v3560_v1, 1 }
 0x11b   : > { %v684_v29 = vpop.f32.mrf.mxu0  ;;  %v3591_v30 = vsel %vm942_vm4, %v1021_v24, %v1025_v25  ;;  %v3028_v24 = vld [vmem:[%s4032_s5 + $0x238] sm:$0xff] }
 0x11c   : > { %v826_v31 = vpack.c.b16 %v814_v27, %v813_v26  ;;  %v685_v33 = vadd.f32 %v3352_v41, %v684_v29  ;;  %1801 = vmatmul.bf16.gmra.mxu2 %v3591_v30  ;;  %2106 = vmatpush.bf16.msra.mxu3 %v3028_v24  ;;  %v1103_v27 = vrot.slane %v3426_v18, 1  ;;  %v1104_v29 = vrot.slane %v3467_v52, 1  ;;  %v3007_v24 = vld [vmem:[%s4032_s5 + $0x190] sm:$0xff] }
 0x11d   : > { %v1106_v52 = vrot.slane %v3463_v51, 1 }
 0x11e   : > { %v879_v39 = vshrl.u32 %v826_v31, 16  ;;  %1967 = vmatmul.bf16.vlgmr.msra.gmra.mxu1 %v3389_v32  ;;  %v882_v42 = vshll.u32 %v826_v31, 16  ;;  %v703_v44 = vmax.f32 %v685_v33, 0.0  ;;  %v3658_v31 = vsel %vm1093_vm3, %v1103_v27, %v1104_v29  ;;  %v3010_v33 = vld [vmem:[%s4032_s5 + $0x1a8] sm:$0xff] }
 0x11f   : > { %2010 = vmatpush.bf16.msrb.mxu2 %v3010_v33 }
 0x120   : > { %v881_v40 = vrot.slane %v879_v39, 7  ;;  %v719_v50 = vpack.c.bf16 %v703_v44, %v703_v44  ;;  %2107 = vmatpush.bf16.msra.mxu3 %v3027_v34 }
 0x122   : > { %v884_v46 = vor.u32 %v882_v42, %v881_v40  ;;  %v3616_v48 = vsel %vm3371_vm2, %v881_v40, 0  ;;  %v815_v0 = vunpack.c.l.b16 %v719_v50  ;;  %v1107_v42 = vrot.slane %v3505_v23, 1 }
 0x123   : > { %v686_v49 = vpop.f32.mrf.mxu0  ;;  %v1035_v59 = vshll.u32 %v3616_v48, 16 }
 0x124   : > { %v687_v56 = vadd.f32 %v3352_v41, %v686_v49  ;;  %v3622_v57 = vsel %vm3371_vm2, 0, %v884_v46  ;;  %v3681_v46 = vsel %vm1093_vm3, %v1106_v52, %v1107_v42  ;;  %v3026_v49 = vld [vmem:[%s4032_s5 + $0x228] sm:$0xff] }
 0x125   : > { %1899 = vmatmul.bf16.gmra.mxu0 %v3622_v57  ;;  %v1030_v58 = vshll.u32 %v3622_v57, 16  ;;  %v1028_v61 = vshrl.u32 %v3622_v57, 16  ;;  %v1037_v41 = vrot.slane %v1035_v59, 1  ;;  %2108 = vmatpush.bf16.msra.mxu3 %v3026_v49  ;;  %v1115_v29 = vrot.slane %v3622_v57, 1 }
 0x126   : > { %v704_v60 = vmax.f32 %v687_v56, 0.0 }
 0x127   : > { %1752 = vmatmul.bf16.gmra.mxu3 %v3569_v7  ;;  %v1032_v63 = vrot.slane %v1030_v58, 1  ;;  %v1109_v58 = vrot.slane %v3501_v22, 1 }
 0x128   : > { %v720_v2 = vpack.c.bf16 %v704_v60, %v704_v60 }
 0x129   : > { %v1033_v3 = vor.u32 %v1032_v63, %v1028_v61  ;;  %v1110_v63 = vrot.slane %v3490_v15, 1 }
 0x12a   : > { %v816_v8 = vunpack.c.l.b16 %v720_v2 }
 0x12b   : > { %v3631_v10 = vsel %vm942_vm4, %v1033_v3, %v1037_v41  ;;  %v3702_v2 = vsel %vm1093_vm3, %v1109_v58, %v1110_v63  ;;  %v3008_v3 = vld [vmem:[%s4032_s5 + $0x198] sm:$0xff] }
 0x12c   : > { %v827_v13 = vpack.c.b16 %v816_v8, %v815_v0  ;;  %1806 = vmatmul.bf16.gmra.mxu2 %v3631_v10 }
 0x12e   : > { %v886_v17 = vshrl.u32 %v827_v13, 16  ;;  %v889_v21 = vshll.u32 %v827_v13, 16  ;;  %1972 = vmatmul.bf16.gmra.mxu1 %v3636_v14 }
 0x130   : > { %v3645_v19 = vrot.slane %v886_v17, 7 }
 0x132   : > { %v891_v25 = vor.u32 %v889_v21, %v3645_v19  ;;  %v3724_v21 = vsel %vm1093_vm3, %v1112_v5, %v1113_v16 }
 0x134   : > { %v3650_v26 = vsel %vm3371_vm2, 0, %v891_v25 }
 0x135   : > { %1904 = vmatmul.bf16.gmra.mxu0 %v3650_v26  ;;  %v1042_v16 = vshll.u32 %v3650_v26, 16 }
 0x137   : > { %1757 = vmatmul.bf16.gmra.mxu3 %v3622_v57 }
 0x13c   : > { %1820 = vmatmul.bf16.vlgmr.msra.gmra.mxu2 %v3392_v35  ;;  %v3672_v35 = vld [vmem:[%s4033_s6] ss:$0 sm:$0xff] }
 0x13e   : > { %1977 = vmatmul.bf16.gmra.mxu1 %v3658_v31 }
 0x142   : > { %v3735_v25 = vpop.f32.mrf.mxu0 }
 0x145   : > { %2065 = vmatmul.bf16.vlgmr.msra.gmra.mxu0 %v3443_v36 }
 0x147   : > { %1918 = vmatmul.bf16.vlgmr.msrb.gmra.mxu3 %v3409_v4  ;;  %v3009_v4 = vld [vmem:[%s4032_s5 + $0x1a0] sm:$0xff] }
 0x148   : > { %2011 = vmatpush.bf16.msrb.mxu2 %v3009_v4 }
 0x14a   : > { %v1723_v37 = vpop.f32.mrf.mxu3  ;;  %v3751_v42 = vpop.f32.mrf.mxu0 }
 0x14b   : > { %v1724_v39 = vadd.f32 %v3672_v35, %v1723_v37  ;;  %v1772_v40 = vpop.f32.mrf.mxu1  ;;  %v1116_v37 = vrot.slane %v3616_v48, 1 }
 0x14c   : > { %1825 = vmatmul.bf16.gmra.mxu2 %v3389_v32 }
 0x14d   : > { %v3678_v44 = vadd.f32 %v1772_v40, %v1724_v39  ;;  %2012 = vmatpush.bf16.msrb.mxu2 %v3008_v3  ;;  %v3006_v39 = vld [vmem:[%s4032_s5 + $0x188] sm:$0xff]  ;;  %v3023_v40 = vld [vmem:[%s4032_s5 + $0x210] sm:$0xff]  ;;  %v3758_v49 = vsel %vm1093_vm3, %v1115_v29, %v1116_v37  ;;  %v1040_v29 = vshrl.u32 %v3650_v26, 16 }
 0x14e   : > { %1982 = vmatmul.bf16.gmra.mxu1 %v3681_v46 }
 0x151   : > { %2013 = vmatpush.bf16.msrb.mxu2 %v3007_v24 }
 0x152   : > { %v1725_v23 = vpop.f32.mrf.mxu3 }
 0x153   : > { %v1726_v32 = vadd.f32 %v3672_v35, %v1725_v23  ;;  %v1774_v50 = vpop.f32.mrf.mxu1 }
 0x155   : > { %v3691_v56 = vadd.f32 %v1774_v50, %v1726_v32  ;;  %2070 = vmatmul.bf16.gmra.mxu0 %v3483_v6  ;;  %2014 = vmatpush.bf16.msrb.mxu2 %v3006_v39  ;;  %v940_v32 = vsel %vm3371_vm2, %v3645_v19, 0  ;;  %v3769_v50 = vpop.f32.mrf.mxu0  ;;  %v3005_v19 = vld [vmem:[%s4032_s5 + $0x180] sm:$0xff] }
 0x157   : > { %1923 = vmatmul.bf16.gmra.mxu3 %v3443_v36  ;;  %v3025_v36 = vld [vmem:[%s4032_s5 + $0x220] sm:$0xff] }
 0x158   : > { %2109 = vmatpush.bf16.msra.mxu3 %v3025_v36 }
 0x159   : > { %2015 = vmatpush.bf16.msrb.mxu2 %v3005_v19 }
 0x15a   : > { %v1728_v59 = vpop.f32.mrf.mxu3 }
 0x15b   : > { %v1729_v60 = vadd.f32 %v3672_v35, %v1728_v59  ;;  %v1777_v61 = vpop.f32.mrf.mxu1  ;;  %v1118_v59 = vrot.slane %v3650_v26, 1 }
 0x15c   : > { %1830 = vmatmul.bf16.gmra.mxu2 %v3636_v14 }
 0x15d   : > { %v3699_v0 = vadd.f32 %v1777_v61, %v1729_v60  ;;  %v1119_v60 = vrot.slane %v940_v32, 1  ;;  %3045 = vmatpush.bf16.msra.mxu2 %v3516_v28  ;;  %v1047_v28 = vshll.u32 %v940_v32, 16 }
 0x15e   : > { %1987 = vmatmul.bf16.gmra.mxu1 %v3702_v2 }
 0x15f   : > { %v3777_v36 = vsel %vm1093_vm3, %v1118_v59, %v1119_v60  ;;  %v1049_v37 = vrot.slane %v1047_v28, 1 }
 0x161   : > { %3046 = vmatpush.bf16.msra.mxu2 %v3526_v43  ;;  %v3021_v43 = vld [vmem:[%s4032_s5 + $0x200] sm:$0xff] }
 0x162   : > { %v3711_v15 = vpop.f32.mrf.mxu3 }
 0x163   : > { %v3713_v41 = vpop.f32.mrf.mxu1 }
 0x165   : > { %2075 = vmatmul.bf16.gmra.mxu0 %v3537_v53  ;;  %3047 = vmatpush.bf16.msra.mxu2 %v3542_v54 }
 0x167   : > { %1928 = vmatmul.bf16.gmra.mxu3 %v3483_v6  ;;  %v3024_v6 = vld [vmem:[%s4032_s5 + $0x218] sm:$0xff] }
 0x168   : > { %2110 = vmatpush.bf16.msra.mxu3 %v3024_v6 }
 0x169   : > { %3048 = vmatpush.bf16.msra.mxu2 %v3556_v62 }
 0x16a   : > { %v1733_v8 = vpop.f32.mrf.mxu3 }
 0x16b   : > { %v1734_v12 = vadd.f32 %v3672_v35, %v1733_v8  ;;  %v1782_v13 = vpop.f32.mrf.mxu1 }
 0x16c   : > { %1835 = vmatmul.bf16.gmra.mxu2 %v3658_v31  ;;  %2111 = vmatpush.bf16.msra.mxu3 %v3023_v40 }
 0x16d   : > { %v3721_v17 = vadd.f32 %v1782_v13, %v1734_v12  ;;  %v3790_v12 = vpop.f32.mrf.mxu0  ;;  %3049 = vmatpush.bf16.msra.mxu2 %v3577_v11 }
 0x16e   : > { %1992 = vmatmul.bf16.gmra.mxu1 %v3724_v21 }
 0x171   : > { %3050 = vmatpush.bf16.msra.mxu2 %v3588_v20 }
 0x172   : > { %v3733_v1 = vpop.f32.mrf.mxu3 }
 0x173   : > { %v3737_v27 = vpop.f32.mrf.mxu1 }
 0x175   : > { %2080 = vmatmul.bf16.gmra.mxu0 %v3529_v47  ;;  %3051 = vmatpush.bf16.msra.mxu2 %v3605_v38 }
 0x177   : > { %1933 = vmatmul.bf16.gmra.mxu3 %v3537_v53  ;;  %v3753_v53 = vpop.f32.mrf.mxu2 }
 0x179   : > { %3052 = vmatpush.bf16.msra.mxu2 %v3612_v45 }
 0x17a   : > { %v1738_v33 = vpop.f32.mrf.mxu3 }
 0x17b   : > { %v1739_v34 = vadd.f32 %v3672_v35, %v1738_v33  ;;  %v1787_v52 = vpop.f32.mrf.mxu1  ;;  %v1044_v33 = vrot.slane %v1042_v16, 1 }
 0x17c   : > { %1840 = vmatmul.bf16.gmra.mxu2 %v3681_v46 }
 0x17d   : > { %v3755_v4 = vadd.f32 %v1787_v52, %v1739_v34  ;;  %v3800_v34 = vpop.f32.mrf.mxu0  ;;  %v1045_v54 = vor.u32 %v1044_v33, %v1040_v29  ;;  %v3036_v29 = vld [vmem:[%s4034_s7 + $0x38] sm:$0xff] }
 0x17e   : > { %1997 = vmatmul.bf16.gmra.mxu1 %v3758_v49 }
 0x17f   : > { %v3771_v58 = vpop.f32.mrf.mxu2  ;;  %v1050_v32 = vsel %vm942_vm4, %v1045_v54, %v1049_v37  ;;  %2247 = vmatpush.bf16.msrb.mxu1 %v3036_v29 }
 0x182   : > { %v3761_v48 = vpop.f32.mrf.mxu3 }
 0x183   : > { %v3763_v23 = vpop.f32.mrf.mxu1 }
 0x185   : > { %2085 = vmatmul.bf16.gmra.mxu0 %v3591_v30  ;;  %v3814_v62 = vpop.f32.mrf.mxu0 }
 0x187   : > { %1938 = vmatmul.bf16.gmra.mxu3 %v3529_v47  ;;  %v3022_v47 = vld [vmem:[%s4032_s5 + $0x208] sm:$0xff] }
 0x188   : > { %2112 = vmatpush.bf16.msra.mxu3 %v3022_v47 }
 0x18a   : > { %v1743_v61 = vpop.f32.mrf.mxu3 }
 0x18b   : > { %v1744_v63 = vadd.f32 %v3672_v35, %v1743_v61  ;;  %v1792_v3 = vpop.f32.mrf.mxu1 }
 0x18c   : > { %1845 = vmatmul.bf16.gmra.mxu2 %v3702_v2  ;;  %2113 = vmatpush.bf16.msra.mxu3 %v3021_v43 }
 0x18d   : > { %v3786_v5 = vadd.f32 %v1792_v3, %v1744_v63 }
 0x18e   : > { %2002 = vmatmul.bf16.gmra.mxu1 %v3777_v36 }
 0x18f   : > { %v1797_v8 = vpop.f32.mrf.mxu2 }
 0x192   : > { %v3792_v13 = vpop.f32.mrf.mxu3 }
 0x195   : > { %2090 = vmatmul.bf16.gmra.mxu0 %v3631_v10 }
 0x197   : > { %v1799_v24 = vpop.f32.mrf.mxu2  ;;  %1943 = vmatmul.bf16.gmra.mxu3 %v3591_v30 }
 0x19a   : > { %v1748_v6 = vpop.f32.mrf.mxu3 }
 0x19b   : > { %v1749_v52 = vadd.f32 %v3672_v35, %v1748_v6 }
 0x19c   : > { %1850 = vmatmul.bf16.gmra.mxu2 %v3724_v21 }
 0x19d   : > { %v3808_v30 = vadd.f32 %v1797_v8, %v1749_v52 }
 0x19f   : > { %v1802_v39 = vpop.f32.mrf.mxu2 }
 0x1a2   : > { %v1750_v40 = vpop.f32.mrf.mxu3 }
 0x1a3   : > { %v1751_v59 = vadd.f32 %v3672_v35, %v1750_v40 }
 0x1a5   : > { %2095 = vmatmul.bf16.gmra.mxu0 %v1050_v32  ;;  %v3816_v60 = vadd.f32 %v1799_v24, %v1751_v59  ;;  %v3035_v59 = vld [vmem:[%s4034_s7 + $0x30] sm:$0xff] }
 0x1a6   : > { %2248 = vmatpush.bf16.msrb.mxu1 %v3035_v59 }
 0x1a7   : > { %v1804_v61 = vpop.f32.mrf.mxu2  ;;  %1948 = vmatmul.bf16.gmra.mxu3 %v3631_v10 }
 0x1aa   : > { %v1753_v63 = vpop.f32.mrf.mxu3 }
 0x1ab   : > { %v1754_v11 = vadd.f32 %v3672_v35, %v1753_v63 }
 0x1ac   : > { %1855 = vmatmul.bf16.gmra.mxu2 %v3758_v49 }
 0x1ad   : > { %v3823_v3 = vadd.f32 %v1802_v39, %v1754_v11 }
 0x1af   : > { %v1807_v20 = vpop.f32.mrf.mxu2 }
 0x1b2   : > { %v1755_v19 = vpop.f32.mrf.mxu3 }
 0x1b3   : > { %v1756_v47 = vadd.f32 %v3672_v35, %v1755_v19 }
 0x1b5   : > { %v3826_v8 = vadd.f32 %v1804_v61, %v1756_v47 }
 0x1b7   : > { %v1809_v16 = vpop.f32.mrf.mxu2  ;;  %1953 = vmatmul.bf16.gmra.mxu3 %v1050_v32 }
 0x1ba   : > { %v1758_v10 = vpop.f32.mrf.mxu3 }
 0x1bb   : > { %v1759_v38 = vadd.f32 %v3672_v35, %v1758_v10 }
 0x1bc   : > { %2016 = vmatmul.bf16.vlgmr.msrb.gmra.mxu2 %v3405_v55 }
 0x1bd   : > { %v3830_v24 = vadd.f32 %v1807_v20, %v1759_v38 }
 0x1bf   : > { %v1821_v45 = vpop.f32.mrf.mxu2 }
 0x1c0   : > { %v1822_v6 = vadd.f32 %v1821_v45, %v3678_v44  ;;  %v1885_v44 = vpop.f32.mrf.mxu0 }
 0x1c2   : > { %v1760_v33 = vpop.f32.mrf.mxu3  ;;  %v1871_v54 = vadd.f32 %v3735_v25, %v1822_v6 }
 0x1c3   : > { %v1761_v28 = vadd.f32 %v3672_v35, %v1760_v33 }
 0x1c5   : > { %v3837_v52 = vadd.f32 %v1809_v16, %v1761_v28 }
 0x1c7   : > { %v1823_v43 = vpop.f32.mrf.mxu2  ;;  %2114 = vmatmul.bf16.vlgmr.msra.gmra.mxu3 %v3636_v14  ;;  %v1731_v14 = vadd.f32 %v3672_v35, %v3711_v15 }
 0x1c8   : > { %v1824_v55 = vadd.f32 %v1823_v43, %v3691_v56  ;;  %v1887_v11 = vpop.f32.mrf.mxu0  ;;  %v3033_v43 = vld [vmem:[%s4034_s7 + $0x20] sm:$0xff] }
 0x1c9   : > { %v1780_v63 = vadd.f32 %v3713_v41, %v1731_v14  ;;  %v3034_v41 = vld [vmem:[%s4034_s7 + $0x28] sm:$0xff]  ;;  %v3032_v14 = vld [vmem:[%s4034_s7 + $0x18] sm:$0xff] }
 0x1ca   : > { %v1919_v37 = vpop.f32.mrf.mxu3  ;;  %v1873_v61 = vadd.f32 %v3751_v42, %v1824_v55  ;;  %2249 = vmatpush.bf16.msrb.mxu1 %v3034_v41 }
 0x1cb   : > { %v3842_v39 = vadd.f32 %v1919_v37, %v1871_v54 }
 0x1cc   : > { %2021 = vmatmul.bf16.gmra.mxu2 %v3426_v18 }
 0x1ce   : > { %2250 = vmatpush.bf16.msrb.mxu1 %v3033_v43 }
 0x1cf   : > { %v1826_v40 = vpop.f32.mrf.mxu2 }
 0x1d0   : > { %v1827_v32 = vadd.f32 %v1826_v40, %v3699_v0  ;;  %v1890_v15 = vpop.f32.mrf.mxu0 }
 0x1d2   : > { %v1921_v56 = vpop.f32.mrf.mxu3  ;;  %v1876_v20 = vadd.f32 %v3769_v50, %v1827_v32  ;;  %2251 = vmatpush.bf16.msrb.mxu1 %v3032_v14 }
 0x1d3   : > { %v3852_v25 = vadd.f32 %v1921_v56, %v1873_v61 }
 0x1d7   : > { %v1828_v18 = vpop.f32.mrf.mxu2  ;;  %2119 = vmatmul.bf16.gmra.mxu3 %v3658_v31  ;;  %v1736_v31 = vadd.f32 %v3672_v35, %v3733_v1 }
 0x1d8   : > { %v1829_v0 = vadd.f32 %v1828_v18, %v1780_v63  ;;  %v1892_v29 = vpop.f32.mrf.mxu0  ;;  %v3096_v18 = vld [vmem:[%s4031_s4] ss:$0 sm:$0xff] }
 0x1d9   : > { %v1785_v45 = vadd.f32 %v3737_v27, %v1736_v31 }
 0x1da   : > { %v1924_v19 = vpop.f32.mrf.mxu3  ;;  %v1878_v10 = vadd.f32 %v3790_v12, %v1829_v0  ;;  %v770_v0 = vadd.f32 %v3096_v18, %v3771_v58 }
 0x1db   : > { %v3857_v47 = vadd.f32 %v1924_v19, %v1876_v20 }
 0x1dc   : > { %2026 = vmatmul.bf16.gmra.mxu2 %v3463_v51 }
 0x1df   : > { %v1831_v42 = vpop.f32.mrf.mxu2 }
 0x1e0   : > { %v1832_v16 = vadd.f32 %v1831_v42, %v3721_v17  ;;  %v1895_v54 = vpop.f32.mrf.mxu0 }
 0x1e2   : > { %v1926_v38 = vpop.f32.mrf.mxu3  ;;  %v1881_v17 = vadd.f32 %v3800_v34, %v1832_v16  ;;  %v773_v16 = vmax.f32 %v770_v0, 0.0 }
 0x1e3   : > { %v3867_v50 = vadd.f32 %v1926_v38, %v1878_v10  ;;  %v774_v10 = vstv %s507_s30 }
 0x1e4   : > { %v776_v38 = vmul.f32 %v774_v10, %v773_v16 }
 0x1e7   : > { %v1833_v51 = vpop.f32.mrf.mxu2  ;;  %2124 = vmatmul.bf16.gmra.mxu3 %v3681_v46  ;;  %v1741_v46 = vadd.f32 %v3672_v35, %v3761_v48 }
 0x1e8   : > { %v1834_v6 = vadd.f32 %v1833_v51, %v1785_v45 }
 0x1ea   : > { %v1929_v33 = vpop.f32.mrf.mxu3  ;;  %v1883_v27 = vadd.f32 %v3814_v62, %v1834_v6  ;;  %v1897_v62 = vpop.f32.mrf.mxu0 }
 0x1eb   : > { %v3872_v28 = vadd.f32 %v1929_v33, %v1881_v17  ;;  %v778_v17 = vpack.c.bf16 %v776_v38, %v776_v38 }
 0x1ec   : > { %2031 = vmatmul.bf16.gmra.mxu2 %v3501_v22  ;;  %v1790_v22 = vadd.f32 %v3763_v23, %v1741_v46 }
 0x1ef   : > { %v1836_v12 = vpop.f32.mrf.mxu2 }
 0x1f0   : > { %v1837_v1 = vadd.f32 %v1836_v12, %v3755_v4 }
 0x1f2   : > { %v1931_v34 = vpop.f32.mrf.mxu3  ;;  %v1886_v40 = vadd.f32 %v1885_v44, %v1837_v1  ;;  %v1794_v44 = vpop.f32.mrf.mxu1  ;;  %v818_v1 = vunpack.c.l.b16 %v778_v17 }
 0x1f3   : > { %v3882_v55 = vadd.f32 %v1931_v34, %v1883_v27 }
 0x1f7   : > { %v1838_v37 = vpop.f32.mrf.mxu2  ;;  %2129 = vmatmul.bf16.gmra.mxu3 %v3702_v2  ;;  %v1746_v2 = vadd.f32 %v3672_v35, %v3792_v13  ;;  %v1900_v35 = vpop.f32.mrf.mxu0 }
 0x1f8   : > { %v1839_v4 = vadd.f32 %v1838_v37, %v1790_v22 }
 0x1fa   : > { %v1934_v32 = vpop.f32.mrf.mxu3  ;;  %v1888_v23 = vadd.f32 %v1887_v11, %v1839_v4 }
 0x1fb   : > { %v3886_v59 = vadd.f32 %v1934_v32, %v1886_v40  ;;  %v3030_v40 = vld [vmem:[%s4034_s7 + $0x8] sm:$0xff] }
 0x1fc   : > { %2036 = vmatmul.bf16.gmra.mxu2 %v3569_v7  ;;  %v1795_v7 = vadd.f32 %v1794_v44, %v1746_v2 }
 0x1ff   : > { %v1841_v61 = vpop.f32.mrf.mxu2  ;;  %v1902_v51 = vpop.f32.mrf.mxu0 }
 0x200   : > { %v1842_v48 = vadd.f32 %v1841_v61, %v3786_v5  ;;  %v768_v5 = vadd.f32 %v3096_v18, %v3753_v53 }
 0x202   : > { %v1936_v56 = vpop.f32.mrf.mxu3  ;;  %v1891_v11 = vadd.f32 %v1890_v15, %v1842_v48  ;;  %v772_v42 = vmax.f32 %v768_v5, 0.0 }
 0x203   : > { %v3896_v63 = vadd.f32 %v1936_v56, %v1888_v23  ;;  %v1968_v23 = vpop.f32.mrf.mxu1 }
 0x204   : > { %v775_v31 = vmul.f32 %v774_v10, %v772_v42 }
 0x206   : > { %v777_v6 = vpack.c.bf16 %v775_v31, %v775_v31 }
 0x207   : > { %v1843_v20 = vpop.f32.mrf.mxu2  ;;  %2134 = vmatmul.bf16.gmra.mxu3 %v3724_v21  ;;  %v3031_v21 = vld [vmem:[%s4034_s7 + $0x10] sm:$0xff] }
 0x208   : > { %v1844_v13 = vadd.f32 %v1843_v20, %v1795_v7  ;;  %2252 = vmatpush.bf16.msrb.mxu1 %v3031_v21  ;;  %v817_v12 = vunpack.c.l.b16 %v777_v6 }
 0x20a   : > { %v1939_v19 = vpop.f32.mrf.mxu3  ;;  %v1893_v45 = vadd.f32 %v1892_v29, %v1844_v13  ;;  %v828_v46 = vpack.c.b16 %v818_v1, %v817_v12  ;;  %v1905_v29 = vpop.f32.mrf.mxu0 }
 0x20b   : > { %v3904_v41 = vadd.f32 %v1939_v19, %v1891_v11 }
 0x20c   : > { %2041 = vmatmul.bf16.gmra.mxu2 %v3622_v57  ;;  %v893_v37 = vshrl.u32 %v828_v46, 16  ;;  %2253 = vmatpush.bf16.msrb.mxu1 %v3030_v40  ;;  %v896_v61 = vshll.u32 %v828_v46, 16 }
 0x20f   : > { %v1846_v53 = vpop.f32.mrf.mxu2 }
 0x210   : > { %v1847_v58 = vadd.f32 %v1846_v53, %v3808_v30 }
 0x212   : > { %v1941_v15 = vpop.f32.mrf.mxu3  ;;  %v1896_v30 = vadd.f32 %v1895_v54, %v1847_v58  ;;  %v895_v54 = vrot.slane %v893_v37, 7  ;;  %v1907_v48 = vpop.f32.mrf.mxu0 }
 0x213   : > { %v3911_v33 = vadd.f32 %v1941_v15, %v1893_v45 }
 0x214   : > { %v941_v5 = vsel %vm3371_vm2, %v895_v54, 0 }
 0x215   : > { %v1122_v19 = vrot.slane %v941_v5, 1  ;;  %v1059_v31 = vshll.u32 %v941_v5, 16 }
 0x217   : > { %v1848_v57 = vpop.f32.mrf.mxu2  ;;  %2139 = vmatmul.bf16.gmra.mxu3 %v3758_v49 }
 0x218   : > { %v1849_v43 = vadd.f32 %v1848_v57, %v3816_v60 }
 0x21a   : > { %v1944_v27 = vpop.f32.mrf.mxu3  ;;  %v1898_v32 = vadd.f32 %v1897_v62, %v1849_v43  ;;  %v2066_v0 = vpop.f32.mrf.mxu0 }
 0x21b   : > { %v3915_v34 = vadd.f32 %v1944_v27, %v1896_v30 }
 0x21c   : > { %2046 = vmatmul.bf16.gmra.mxu2 %v3650_v26  ;;  %v898_v26 = vor.u32 %v896_v61, %v895_v54 }
 0x21e   : > { %v931_v62 = vsel %vm3371_vm2, 0, %v898_v26 }
 0x21f   : > { %v1851_v22 = vpop.f32.mrf.mxu2  ;;  %v1054_v7 = vshll.u32 %v931_v62, 16  ;;  %v1121_v11 = vrot.slane %v931_v62, 1  ;;  %v1052_v42 = vshrl.u32 %v931_v62, 16 }
 0x220   : > { %v1852_v4 = vadd.f32 %v1851_v22, %v3823_v3  ;;  %v1969_v22 = vadd.f32 %v1968_v23, %v3842_v39 }
 0x221   : > { %v1056_v16 = vrot.slane %v1054_v7, 1  ;;  %v1123_v9 = vsel %vm1093_vm3, %v1121_v11, %v1122_v19 }
 0x222   : > { %v1946_v49 = vpop.f32.mrf.mxu3  ;;  %v1901_v3 = vadd.f32 %v1900_v35, %v1852_v4  ;;  %v1970_v35 = vpop.f32.mrf.mxu1 }
 0x223   : > { %v3922_v60 = vadd.f32 %v1946_v49, %v1898_v32  ;;  %v1057_v38 = vor.u32 %v1056_v16, %v1052_v42  ;;  %v2068_v45 = vpop.f32.mrf.mxu0  ;;  %v1971_v37 = vadd.f32 %v1970_v35, %v3852_v25 }
 0x227   : > { %v1853_v14 = vpop.f32.mrf.mxu2  ;;  %2144 = vmatmul.bf16.gmra.mxu3 %v3777_v36 }
 0x228   : > { %v1854_v2 = vadd.f32 %v1853_v14, %v3826_v8  ;;  %v3029_v8 = vld [vmem:[%s4034_s7] sm:$0xff] }
 0x229   : > { %2254 = vmatpush.bf16.msrb.mxu1 %v3029_v8 }
 0x22a   : > { %v1949_v56 = vpop.f32.mrf.mxu3  ;;  %v1903_v20 = vadd.f32 %v1902_v51, %v1854_v2  ;;  %v1973_v17 = vpop.f32.mrf.mxu1 }
 0x22b   : > { %v3926_v44 = vadd.f32 %v1949_v56, %v1901_v3  ;;  %v2071_v30 = vpop.f32.mrf.mxu0  ;;  %v1974_v39 = vadd.f32 %v1973_v17, %v3857_v47 }
 0x22c   : > { %2051 = vmatmul.bf16.gmra.mxu2 %v931_v62 }
 0x22f   : > { %v1856_v18 = vpop.f32.mrf.mxu2 }
 0x230   : > { %v1857_v36 = vadd.f32 %v1856_v18, %v3830_v24  ;;  %v1061_v24 = vrot.slane %v1059_v31, 1 }
 0x232   : > { %v1951_v13 = vpop.f32.mrf.mxu3  ;;  %v1906_v21 = vadd.f32 %v1905_v29, %v1857_v36  ;;  %v1062_v6 = vsel %vm942_vm4, %v1057_v38, %v1061_v24  ;;  %v1975_v27 = vpop.f32.mrf.mxu1 }
 0x233   : > { %v3936_v10 = vadd.f32 %v1951_v13, %v1903_v20  ;;  %v2073_v40 = vpop.f32.mrf.mxu0  ;;  %v1976_v5 = vadd.f32 %v1975_v27, %v3867_v50 }
 0x237   : > { %v1858_v53 = vpop.f32.mrf.mxu2  ;;  %2149 = vmatmul.bf16.gmra.mxu3 %v1123_v9 }
 0x238   : > { %v1859_v58 = vadd.f32 %v1858_v53, %v3837_v52 }
 0x23a   : > { %v1954_v51 = vpop.f32.mrf.mxu3  ;;  %v1908_v1 = vadd.f32 %v1907_v48, %v1859_v58  ;;  %v1978_v54 = vpop.f32.mrf.mxu1 }
 0x23b   : > { %v3940_v15 = vadd.f32 %v1954_v51, %v1906_v21  ;;  %v2076_v7 = vpop.f32.mrf.mxu0  ;;  %v1979_v47 = vadd.f32 %v1978_v54, %v3872_v28 }
 0x23c   : > { %2100 = vmatmul.bf16.vlgmr.msra.gmra.mxu2 %v1062_v6 }
 0x23f   : > { %v2017_v12 = vpop.f32.mrf.mxu2 }
 0x240   : > { %v2018_v29 = vadd.f32 %v2017_v12, %v1969_v22 }
 0x242   : > { %v1956_v57 = vpop.f32.mrf.mxu3  ;;  %v2067_v32 = vadd.f32 %v2066_v0, %v2018_v29  ;;  %v1980_v23 = vpop.f32.mrf.mxu1 }
 0x243   : > { %v3943_v43 = vadd.f32 %v1956_v57, %v1908_v1  ;;  %v2078_v13 = vpop.f32.mrf.mxu0  ;;  %v1981_v50 = vadd.f32 %v1980_v23, %v3882_v55 }
 0x247   : > { %v2019_v46 = vpop.f32.mrf.mxu2 }
 0x248   : > { %v2020_v4 = vadd.f32 %v2019_v46, %v1971_v37 }
 0x24a   : > { %v2115_v52 = vpop.f32.mrf.mxu3  ;;  %v2069_v14 = vadd.f32 %v2068_v45, %v2020_v4  ;;  %v1983_v42 = vpop.f32.mrf.mxu1 }
 0x24b   : > { %v2116_v61 = vadd.f32 %v2115_v52, %v2067_v32  ;;  %v2081_v58 = vpop.f32.mrf.mxu0  ;;  %v1984_v29 = vadd.f32 %v1983_v42, %v3886_v59 }
 0x24d   : > { %v2155_v2 = vmax.f32 %v2116_v61, 0.0 }
 0x24f   : > { %v2022_v49 = vpop.f32.mrf.mxu2 }
 0x250   : > { %v2023_v25 = vadd.f32 %v2022_v49, %v1974_v39 }
 0x252   : > { %v2117_v48 = vpop.f32.mrf.mxu3  ;;  %v2072_v36 = vadd.f32 %v2071_v30, %v2023_v25  ;;  %v1985_v45 = vpop.f32.mrf.mxu1 }
 0x253   : > { %v2118_v26 = vadd.f32 %v2117_v48, %v2069_v14  ;;  %v2083_v46 = vpop.f32.mrf.mxu0  ;;  %v1986_v4 = vadd.f32 %v1985_v45, %v3896_v63 }
 0x255   : > { %v2156_v3 = vmax.f32 %v2118_v26, 0.0 }
 0x257   : > { %v2171_v56 = vpack.c.bf16 %v2156_v3, %v2155_v2  ;;  %v2024_v62 = vpop.f32.mrf.mxu2 }
 0x258   : > { %v2025_v0 = vadd.f32 %v2024_v62, %v1976_v5 }
 0x259   : > { %2255 = vmatmul.bf16.vlgmr.msrb.gmra.mxu1 %v2171_v56 }
 0x25a   : > { %v2120_v18 = vpop.f32.mrf.mxu3  ;;  %v2074_v35 = vadd.f32 %v2073_v40, %v2025_v0  ;;  %v1988_v28 = vpop.f32.mrf.mxu1 }
 0x25b   : > { %v2121_v20 = vadd.f32 %v2120_v18, %v2072_v36  ;;  %v2086_v54 = vpop.f32.mrf.mxu0  ;;  %v1989_v59 = vadd.f32 %v1988_v28, %v3904_v41 }
 0x25d   : > { %v2157_v16 = vmax.f32 %v2121_v20, 0.0 }
 0x25f   : > { %v2027_v8 = vpop.f32.mrf.mxu2 }
 0x260   : > { %v2028_v24 = vadd.f32 %v2027_v8, %v1979_v47 }
 0x262   : > { %v2122_v11 = vpop.f32.mrf.mxu3  ;;  %v2077_v51 = vadd.f32 %v2076_v7, %v2028_v24  ;;  %v1990_v48 = vpop.f32.mrf.mxu1 }
 0x263   : > { %v2123_v19 = vadd.f32 %v2122_v11, %v2074_v35  ;;  %v2088_v39 = vpop.f32.mrf.mxu0  ;;  %v1991_v63 = vadd.f32 %v1990_v48, %v3911_v33 }
 0x265   : > { %v2158_v31 = vmax.f32 %v2123_v19, 0.0 }
 0x267   : > { %v2172_v9 = vpack.c.bf16 %v2158_v31, %v2157_v16  ;;  %v2029_v38 = vpop.f32.mrf.mxu2 }
 0x268   : > { %v2030_v21 = vadd.f32 %v2029_v38, %v1981_v50 }
 0x269   : > { %2260 = vmatmul.bf16.gmra.mxu1 %v2172_v9 }
 0x26a   : > { %v2125_v53 = vpop.f32.mrf.mxu3  ;;  %v2079_v12 = vadd.f32 %v2078_v13, %v2030_v21  ;;  %v1993_v25 = vpop.f32.mrf.mxu1 }
 0x26b   : > { %v2126_v17 = vadd.f32 %v2125_v53, %v2077_v51  ;;  %v2091_v11 = vpop.f32.mrf.mxu0  ;;  %v1994_v9 = vadd.f32 %v1993_v25, %v3915_v34 }
 0x26d   : > { %v2159_v30 = vmax.f32 %v2126_v17, 0.0 }
 0x26f   : > { %v2032_v6 = vpop.f32.mrf.mxu2 }
 0x270   : > { %v2033_v55 = vadd.f32 %v2032_v6, %v1984_v29 }
 0x272   : > { %v2127_v1 = vpop.f32.mrf.mxu3  ;;  %v2082_v32 = vadd.f32 %v2081_v58, %v2033_v55  ;;  %v1995_v16 = vpop.f32.mrf.mxu1 }
 0x273   : > { %v2128_v57 = vadd.f32 %v2127_v1, %v2079_v12  ;;  %v1996_v33 = vadd.f32 %v1995_v16, %v3922_v60  ;;  %v2093_v24 = vpop.f32.mrf.mxu0 }
 0x275   : > { %v2160_v27 = vmax.f32 %v2128_v57, 0.0 }
 0x277   : > { %v2173_v22 = vpack.c.bf16 %v2160_v27, %v2159_v30  ;;  %v2034_v52 = vpop.f32.mrf.mxu2 }
 0x278   : > { %v2035_v40 = vadd.f32 %v2034_v52, %v1986_v4 }
 0x279   : > { %2265 = vmatmul.bf16.gmra.mxu1 %v2173_v22 }
 0x27a   : > { %v2130_v37 = vpop.f32.mrf.mxu3  ;;  %v2084_v14 = vadd.f32 %v2083_v46, %v2035_v40  ;;  %v1998_v21 = vpop.f32.mrf.mxu1 }
 0x27b   : > { %v2131_v61 = vadd.f32 %v2130_v37, %v2082_v32  ;;  %v2096_v57 = vpop.f32.mrf.mxu0  ;;  %v1999_v34 = vadd.f32 %v1998_v21, %v3926_v44 }
 0x27d   : > { %v2161_v3 = vmax.f32 %v2131_v61, 0.0 }
 0x27f   : > { %v2037_v49 = vpop.f32.mrf.mxu2 }
 0x280   : > { %v2038_v18 = vadd.f32 %v2037_v49, %v1989_v59 }
 0x282   : > { %v2132_v26 = vpop.f32.mrf.mxu3  ;;  %v2087_v0 = vadd.f32 %v2086_v54, %v2038_v18  ;;  %v2000_v46 = vpop.f32.mrf.mxu1 }
 0x283   : > { %v2133_v2 = vadd.f32 %v2132_v26, %v2084_v14  ;;  %v2001_v52 = vadd.f32 %v2000_v46, %v3936_v10  ;;  %v2098_v55 = vpop.f32.mrf.mxu0 }
 0x285   : > { %v2162_v56 = vmax.f32 %v2133_v2, 0.0 }
 0x287   : > { %v2174_v62 = vpack.c.bf16 %v2162_v56, %v2161_v3  ;;  %v2039_v7 = vpop.f32.mrf.mxu2 }
 0x288   : > { %v2040_v5 = vadd.f32 %v2039_v7, %v1991_v63 }
 0x289   : > { %2270 = vmatmul.bf16.gmra.mxu1 %v2174_v62 }
 0x28a   : > { %v2135_v23 = vpop.f32.mrf.mxu3  ;;  %v2089_v20 = vadd.f32 %v2088_v39, %v2040_v5  ;;  %v2003_v26 = vpop.f32.mrf.mxu1 }
 0x28b   : > { %v2136_v8 = vadd.f32 %v2135_v23, %v2087_v0  ;;  %v2004_v3 = vadd.f32 %v2003_v26, %v3940_v15  ;;  %v3965_v15 = vld [vmem:[%s4035_s8] ss:$0 sm:$0xff] }
 0x28d   : > { %v2163_v19 = vmax.f32 %v2136_v8, 0.0  ;;  %v525_v8 = vld [vmem:[%s3263_s19] sm:$0xff]  }
 0x28f   : > { %v2042_v36 = vpop.f32.mrf.mxu2 }
 0x290   : > { %v2043_v47 = vadd.f32 %v2042_v36, %v1994_v9 }
 0x292   : > { %v2137_v35 = vpop.f32.mrf.mxu3  ;;  %v2092_v50 = vadd.f32 %v2091_v11, %v2043_v47  ;;  %v2005_v56 = vpop.f32.mrf.mxu1 }
 0x293   : > { %v2138_v13 = vadd.f32 %v2137_v35, %v2089_v20  ;;  %v2006_v62 = vadd.f32 %v2005_v56, %v3943_v43  ;;  %v2296_v43 = vunpack.c.l.bf16 %v525_v8 }
 0x295   : > { %v2164_v42 = vmax.f32 %v2138_v13, 0.0 }
 0x297   : > { %v2175_v31 = vpack.c.bf16 %v2164_v42, %v2163_v19  ;;  %v2044_v41 = vpop.f32.mrf.mxu2  ;;  %v2297_v19 = vunpack.c.h.bf16 %v525_v8 }
 0x298   : > { %v2045_v53 = vadd.f32 %v2044_v41, %v1996_v33  ;;  %v527_v41 = vld [vmem:[%s3263_s19 + $0x8] sm:$0xff]  }
 0x299   : > { %2275 = vmatmul.bf16.gmra.mxu1 %v2175_v31 }
 0x29a   : > { %v2140_v38 = vpop.f32.mrf.mxu3  ;;  %v2094_v51 = vadd.f32 %v2093_v24, %v2045_v53 }
 0x29b   : > { %v2141_v45 = vadd.f32 %v2140_v38, %v2092_v50  ;;  %v2298_v38 = vunpack.c.l.bf16 %v527_v41  ;;  %v2299_v50 = vunpack.c.h.bf16 %v527_v41 }
 0x29d   : > { %v2165_v12 = vmax.f32 %v2141_v45, 0.0 }
 0x29f   : > { %v2047_v58 = vpop.f32.mrf.mxu2 }
 0x2a0   : > { %v2048_v60 = vadd.f32 %v2047_v58, %v1999_v34 }
 0x2a2   : > { %v2142_v6 = vpop.f32.mrf.mxu3  ;;  %v2097_v29 = vadd.f32 %v2096_v57, %v2048_v60  ;;  %v531_v60 = vld [vmem:[%s3263_s19 + $0x18] sm:$0xff]  }
 0x2a3   : > { %v2143_v17 = vadd.f32 %v2142_v6, %v2094_v51  ;;  %v529_v51 = vld [vmem:[%s3263_s19 + $0x10] sm:$0xff]  }
 0x2a5   : > { %v2166_v1 = vmax.f32 %v2143_v17, 0.0  ;;  %v2300_v17 = vunpack.c.l.bf16 %v529_v51 }
 0x2a7   : > { %v2176_v30 = vpack.c.bf16 %v2166_v1, %v2165_v12  ;;  %v2049_v27 = vpop.f32.mrf.mxu2 }
 0x2a8   : > { %v2050_v28 = vadd.f32 %v2049_v27, %v2001_v52  ;;  %v2301_v27 = vunpack.c.h.bf16 %v529_v51 }
 0x2a9   : > { %2280 = vmatmul.bf16.gmra.mxu1 %v2176_v30 }
 0x2aa   : > { %v2145_v22 = vpop.f32.mrf.mxu3  ;;  %v2099_v40 = vadd.f32 %v2098_v55, %v2050_v28  ;;  %v2302_v28 = vunpack.c.l.bf16 %v531_v60 }
 0x2ab   : > { %v2146_v4 = vadd.f32 %v2145_v22, %v2097_v29 }
 0x2ad   : > { %v2167_v54 = vmax.f32 %v2146_v4, 0.0 }
 0x2af   : > { %v2052_v37 = vpop.f32.mrf.mxu2 }
 0x2b0   : > { %v2053_v10 = vadd.f32 %v2052_v37, %v2004_v3 }
 0x2b2   : > { %v2147_v32 = vpop.f32.mrf.mxu3 }
 0x2b3   : > { %v2148_v49 = vadd.f32 %v2147_v32, %v2099_v40  ;;  %v2303_v40 = vunpack.c.h.bf16 %v531_v60 }
 0x2b5   : > { %v2168_v61 = vmax.f32 %v2148_v49, 0.0 }
 0x2b7   : > { %v2177_v14 = vpack.c.bf16 %v2168_v61, %v2167_v54  ;;  %v2054_v48 = vpop.f32.mrf.mxu2  ;;  %v533_v61 = vld [vmem:[%s3263_s19 + $0x20] sm:$0xff]  }
 0x2b8   : > { %v2055_v59 = vadd.f32 %v2054_v48, %v2006_v62  ;;  %v2304_v48 = vunpack.c.l.bf16 %v533_v61 }
 0x2b9   : > { %2285 = vmatmul.bf16.gmra.mxu1 %v2177_v14 }
 0x2ba   : > { %v2150_v44 = vpop.f32.mrf.mxu3 }
 0x2bf   : > { %v2101_v2 = vpop.f32.mrf.mxu2 }
 0x2c0   : > { %v2102_v7 = vadd.f32 %v2101_v2, %v2053_v10  ;;  %v2305_v10 = vunpack.c.h.bf16 %v533_v61 }
 0x2c2   : > { %v2151_v23 = vadd.f32 %v2150_v44, %v2102_v7  ;;  %v2152_v63 = vpop.f32.mrf.mxu3 }
 0x2c4   : > { %v2169_v5 = vmax.f32 %v2151_v23, 0.0 }
 0x2c7   : > { %v2103_v39 = vpop.f32.mrf.mxu2 }
 0x2c8   : > { %v2104_v18 = vadd.f32 %v2103_v39, %v2055_v59  ;;  %v535_v59 = vld [vmem:[%s3263_s19 + $0x28] sm:$0xff]  }
 0x2c9   : > { %v2306_v23 = vunpack.c.l.bf16 %v535_v59 }
 0x2ca   : > { %v2153_v25 = vadd.f32 %v2152_v63, %v2104_v18 }
 0x2cc   : > { %v2170_v0 = vmax.f32 %v2153_v25, 0.0 }
 0x2ce   : > { %v2178_v36 = vpack.c.bf16 %v2170_v0, %v2169_v5  ;;  %v2307_v0 = vunpack.c.h.bf16 %v535_v59 }
 0x2d0   : > { %2290 = vmatmul.bf16.gmra.mxu1 %v2178_v36 }
 0x2d6   : > { %v2256_v20 = vpop.f32.mrf.mxu1 }
 0x2d7   : > { %v2257_v35 = vadd.f32 %v3965_v15, %v2256_v20  ;;  %v537_v20 = vld [vmem:[%s3263_s19 + $0x30] sm:$0xff]  }
 0x2d9   : > { %v2312_v13 = vadd.f32 %v2296_v43, %v2257_v35 }
 0x2db   : > { %v2328_v11 = vmax.f32 %v2312_v13, 0.0  ;;  %v2308_v13 = vunpack.c.l.bf16 %v537_v20 }
 0x2dd   : > { %2344 = vst [vmem:[%s3972_s17] sm:$0xff] %v2328_v11 }
 0x2de   : > { %v2258_v42 = vpop.f32.mrf.mxu1 }
 0x2df   : > { %v2259_v16 = vadd.f32 %v3965_v15, %v2258_v42 }
 0x2e1   : > { %v2313_v31 = vadd.f32 %v2297_v19, %v2259_v16 }
 0x2e3   : > { %v2329_v9 = vmax.f32 %v2313_v31, 0.0  ;;  %v2309_v31 = vunpack.c.h.bf16 %v537_v20 }
 0x2e5   : > { %2345 = vst [vmem:[%s3972_s17 + $0x8] sm:$0xff] %v2329_v9 }
 0x2e6   : > { %v2261_v47 = vpop.f32.mrf.mxu1 }
 0x2e7   : > { %v2262_v33 = vadd.f32 %v3965_v15, %v2261_v47 }
 0x2e9   : > { %v2314_v53 = vadd.f32 %v2298_v38, %v2262_v33  ;;  %v539_v33 = vld [vmem:[%s3263_s19 + $0x38] sm:$0xff]  }
 0x2eb   : > { %v2330_v24 = vmax.f32 %v2314_v53, 0.0  ;;  %v2310_v53 = vunpack.c.l.bf16 %v539_v33 }
 0x2ed   : > { %2346 = vst [vmem:[%s3972_s17 + $0x10] sm:$0xff] %v2330_v24 }
 0x2ee   : > { %v2263_v58 = vpop.f32.mrf.mxu1 }
 0x2ef   : > { %v2264_v21 = vadd.f32 %v3965_v15, %v2263_v58 }
 0x2f1   : > { %v2315_v45 = vadd.f32 %v2299_v50, %v2264_v21 }
 0x2f3   : > { %v2331_v6 = vmax.f32 %v2315_v45, 0.0  ;;  %v2311_v45 = vunpack.c.h.bf16 %v539_v33 }
 0x2f5   : > { %2347 = vst [vmem:[%s3972_s17 + $0x18] sm:$0xff] %v2331_v6 }
 0x2f6   : > { %v2266_v12 = vpop.f32.mrf.mxu1 }
 0x2f7   : > { %v2267_v1 = vadd.f32 %v3965_v15, %v2266_v12 }
 0x2f9   : > { %v2316_v57 = vadd.f32 %v2300_v17, %v2267_v1 }
 0x2fb   : > { %v2332_v30 = vmax.f32 %v2316_v57, 0.0 }
 0x2fd   : > { %2348 = vst [vmem:[%s3972_s17 + $0x20] sm:$0xff] %v2332_v30 }
 0x2fe   : > { %v2268_v34 = vpop.f32.mrf.mxu1 }
 0x2ff   : > { %v2269_v46 = vadd.f32 %v3965_v15, %v2268_v34 }
 0x301   : > { %v2317_v22 = vadd.f32 %v2301_v27, %v2269_v46 }
 0x303   : > { %v2333_v52 = vmax.f32 %v2317_v22, 0.0 }
 0x305   : > { %2349 = vst [vmem:[%s3972_s17 + $0x28] sm:$0xff] %v2333_v52 }
 0x306   : > { %v2271_v29 = vpop.f32.mrf.mxu1 }
 0x307   : > { %v2272_v37 = vadd.f32 %v3965_v15, %v2271_v29 }
 0x309   : > { %v2318_v55 = vadd.f32 %v2302_v28, %v2272_v37 }
 0x30b   : > { %v2334_v4 = vmax.f32 %v2318_v55, 0.0 }
 0x30d   : > { %2350 = vst [vmem:[%s3972_s17 + $0x30] sm:$0xff] %v2334_v4 }
 0x30e   : > { %v2273_v32 = vpop.f32.mrf.mxu1 }
 0x30f   : > { %v2274_v49 = vadd.f32 %v3965_v15, %v2273_v32 }
 0x311   : > { %v2319_v54 = vadd.f32 %v2303_v40, %v2274_v49 }
 0x313   : > { %v2335_v14 = vmax.f32 %v2319_v54, 0.0 }
 0x315   : > { %2351 = vst [vmem:[%s3972_s17 + $0x38] sm:$0xff] %v2335_v14 }
 0x316   : > { %v2276_v26 = vpop.f32.mrf.mxu1 }
 0x317   : > { %v2277_v44 = vadd.f32 %v3965_v15, %v2276_v26 }
 0x319   : > { %v2320_v2 = vadd.f32 %v2304_v48, %v2277_v44 }
 0x31b   : > { %v2336_v3 = vmax.f32 %v2320_v2, 0.0 }
 0x31d   : > { %2352 = vst [vmem:[%s3972_s17 + $0x40] sm:$0xff] %v2336_v3 }
 0x31e   : > { %v2278_v56 = vpop.f32.mrf.mxu1 }
 0x31f   : > { %v2279_v62 = vadd.f32 %v3965_v15, %v2278_v56 }
 0x321   : > { %v2321_v7 = vadd.f32 %v2305_v10, %v2279_v62 }
 0x323   : > { %v2337_v39 = vmax.f32 %v2321_v7, 0.0 }
 0x325   : > { %2353 = vst [vmem:[%s3972_s17 + $0x48] sm:$0xff] %v2337_v39 }
 0x326   : > { %v2281_v18 = vpop.f32.mrf.mxu1 }
 0x327   : > { %v2282_v63 = vadd.f32 %v3965_v15, %v2281_v18 }
 0x329   : > { %v2322_v25 = vadd.f32 %v2306_v23, %v2282_v63 }
 0x32b   : > { %v2338_v5 = vmax.f32 %v2322_v25, 0.0 }
 0x32d   : > { %2354 = vst [vmem:[%s3972_s17 + $0x50] sm:$0xff] %v2338_v5 }
 0x32e   : > { %v2283_v36 = vpop.f32.mrf.mxu1 }
 0x32f   : > { %v2284_v8 = vadd.f32 %v3965_v15, %v2283_v36 }
 0x331   : > { %v2323_v43 = vadd.f32 %v2307_v0, %v2284_v8 }
 0x333   : > { %v2339_v35 = vmax.f32 %v2323_v43, 0.0 }
 0x335   : > { %2355 = vst [vmem:[%s3972_s17 + $0x58] sm:$0xff] %v2339_v35 }
 0x336   : > { %v2286_v11 = vpop.f32.mrf.mxu1 }
 0x337   : > { %v2287_v19 = vadd.f32 %v3965_v15, %v2286_v11 }
 0x339   : > { %v2324_v42 = vadd.f32 %v2308_v13, %v2287_v19 }
 0x33b   : > { %v2340_v16 = vmax.f32 %v2324_v42, 0.0 }
 0x33d   : > { %2356 = vst [vmem:[%s3972_s17 + $0x60] sm:$0xff] %v2340_v16 }
 0x33e   : > { %v2288_v41 = vpop.f32.mrf.mxu1 }
 0x33f   : > { %v2289_v9 = vadd.f32 %v3965_v15, %v2288_v41 }
 0x341   : > { %v2325_v38 = vadd.f32 %v2309_v31, %v2289_v9 }
 0x343   : > { %v2341_v47 = vmax.f32 %v2325_v38, 0.0 }
 0x345   : > { %2357 = vst [vmem:[%s3972_s17 + $0x68] sm:$0xff] %v2341_v47 }
 0x34d   : > { %v2291_v24 = vpop.f32.mrf.mxu1 }
 0x34e   : > { %v2292_v50 = vadd.f32 %v3965_v15, %v2291_v24 }
 0x350   : > { %v2326_v58 = vadd.f32 %v2310_v53, %v2292_v50 }
 0x352   : > { %v2342_v21 = vmax.f32 %v2326_v58, 0.0 }
 0x354   : > { %2358 = vst [vmem:[%s3972_s17 + $0x70] sm:$0xff] %v2342_v21 }
 0x355   : > { %v2293_v51 = vpop.f32.mrf.mxu1 }
 0x356   : > { %v2294_v6 = vadd.f32 %v3965_v15, %v2293_v51 }
 0x358   : > { %v2327_v17 = vadd.f32 %v2311_v45, %v2294_v6 }
 0x35a   : > { %v2343_v12 = vmax.f32 %v2327_v17, 0.0 }
 0x35c   : > { %2359 = vst [vmem:[%s3972_s17 + $0x78] sm:$0xff] %v2343_v12 }
 0x35d PF: > { %s19_s13 = sadd.s32 1, %s3135_s13   ;;  %s4040_s30 = smov %s3127_s11 }
 0x35e   : > { %p16_p12 = scmp.ge.s32.totalorder %s19_s13, 6   ;;  %s4041_s10 = smov %s3131_s12 }
 0x35f   : > { %s4042_s11 = smov %s4045_s14  ;;  %s4043_s12 = smov %s4049_s15 }
 0x360   :  { %18 = sbr.rel (!%p16_p12) target bundleno = 3 (0x3), region = 92 }

</bundles_post_ra>
